<compile_context>
chip_gen: v6e
topology: v6e:2x2x1
jax: 0.10.0
libtpu: 0.0.40
codegen_flags: <defaults>
</compile_context>

<pallas_src>
import functools

import jax
import jax.numpy as jnp
from jax.experimental import pallas as pl
from jax.experimental.pallas import tpu as pltpu

_LANE = 128  # TPU lane width; feature dim is padded up to a multiple of this


def _round_up(v, m):
    return ((v + m - 1) // m) * m


# ---------------------------------------------------------------------------
# In-kernel helper: one FHGNNLayer (MessagePassing, aggr='add') on one batch.
#   hqk_bf  : (n, 3*dp) bf16, concatenated [h | h_q | h_k]
#   oh_src  : (E, n) bf16 one-hot of edge_index[0]   (gather)
#   oh_dst  : (E, n) bf16 one-hot of edge_index[1]   (gather)
#   oh_dst_t: (n, E) f32 one-hot^T of edge_index[1]  (scatter-add, kept f32)
#   ea      : (E, 1) f32 edge_attr
# ---------------------------------------------------------------------------
def _layer_body(hqk_bf, oh_src, oh_dst, oh_dst_t, ea, wo, bo, *, dp, dim):
    # Fused source gather of [h | h_q]: one MXU pass, 2*dp output lanes.
    src_g = jnp.dot(oh_src, hqk_bf[:, :2 * dp],
                    preferred_element_type=jnp.float32)           # (E, 2dp)
    x_j = src_g[:, :dp]                                           # h   at src
    hq_g = src_g[:, dp:]                                          # h_q at src
    hk_g = jnp.dot(oh_dst, hqk_bf[:, 2 * dp:],
                   preferred_element_type=jnp.float32)            # (E, dp)

    # per-edge attention logits (padded lanes are zero, so the sum is exact)
    sim = jnp.sum(hq_g * hk_g, axis=-1, keepdims=True) * (float(dim) ** -0.5)
    logits = ea * sim                                             # (E, 1)

    # softmax over ALL edges (reference: F.softmax(dim=1)); f32 throughout.
    # TODO(synk): for large E, keep per-edge scalars in a (1, E) lane-major
    # layout so these reductions run on the lane axis.
    m = jnp.max(logits, axis=0, keepdims=True)
    p = jnp.exp(logits - m)
    w = p / jnp.sum(p, axis=0, keepdims=True)                     # (E, 1)

    # message = w * x_j, scatter-add onto target nodes (kept f32).
    aggr = jnp.dot(oh_dst_t, w * x_j, preferred_element_type=jnp.float32)

    # update: relu(lin_out(aggr))
    out = jnp.dot(aggr.astype(jnp.bfloat16), wo,
                  preferred_element_type=jnp.float32) + bo
    return jnp.maximum(out, 0.0)


# ---------------------------------------------------------------------------
# Whole FHGNN forward for one batch element (single fused kernel).
# ---------------------------------------------------------------------------
def _fhgnn_forward_kernel(*refs, num_levels, dp, dim):
    it = iter(refs)
    x_ref = next(it)                     # (1, N, dp)  f32
    wqk_ref = next(it)                   # (dp, 3dp)   bf16  [We | Wq | Wk]
    bqk_ref = next(it)                   # (1, 3dp)    f32
    wo_ref = next(it)                    # (dp, dp)    bf16
    bo_ref = next(it)                    # (1, dp)     f32
    edge0 = [next(it) for _ in range(4)]                       # level-0 graph
    levels = [[next(it) for _ in range(6)] for _ in range(num_levels)]
    hprime_ref = next(it)                # (1, N, dp)  f32 output

    wo = wo_ref[...]
    bo = bo_ref[...]

    x = x_ref[0]                                               # (N, dp) f32
    # fused input_embed | att_q | att_k projection: one MXU pass, 3dp lanes
    hqk = jnp.dot(x.astype(jnp.bfloat16), wqk_ref[...],
                  preferred_element_type=jnp.float32) + bqk_ref[...]
    hqk_bf = hqk.astype(jnp.bfloat16)                          # (N, 3dp)
    h = hqk[:, :dp]                                            # f32

    oh_src0, oh_dst0, oh_dst_t0, ea0 = edge0
    h_prime = x + h + _layer_body(hqk_bf, oh_src0[...], oh_dst0[...],
                                  oh_dst_t0[...], ea0[...], wo, bo,
                                  dp=dp, dim=dim)

    # hierarchy levels: pool (index_add) -> message passing -> duplicate back
    for pool_ref, src_ref, dst_ref, dst_t_ref, ea_ref, dup_ref in levels:
        hqk_hi = jnp.dot(pool_ref[...], hqk_bf,
                         preferred_element_type=jnp.float32)   # (n_high, 3dp)
        hqk_bf = hqk_hi.astype(jnp.bfloat16)
        h_hat = _layer_body(hqk_bf, src_ref[...], dst_ref[...], dst_t_ref[...],
                            ea_ref[...], wo, bo, dp=dp, dim=dim)
        # duplication gather back to the N original nodes (f32), residual add
        h_prime = h_prime + jnp.dot(dup_ref[...], h_hat,
                                    preferred_element_type=jnp.float32)

    hprime_ref[0] = h_prime


def _const_spec(a):
    zeros = (0,) * a.ndim
    return pl.BlockSpec(a.shape, lambda b: zeros)


def fhgnn_forward(params, x, assignment_list, reversed_assignment_list,
                  edge_index_list, edge_weight_list):
    B, N, D = x.shape
    dp = _round_up(D, _LANE)
    num_levels = len(assignment_list)

    def pad_w(w):      # (D, D) -> (dp, dp), zero pad
        return jnp.pad(w, ((0, dp - D), (0, dp - D)))

    def pad_b(b):      # (D,) -> (1, dp), zero pad
        return jnp.pad(b, (0, dp - D)).reshape(1, dp)

    # fused [We | Wq | Wk] -> one (dp, 3dp) bf16 weight, (1, 3dp) f32 bias
    w_fused = jnp.concatenate(
        [pad_w(params["we"]), pad_w(params["wq"]), pad_w(params["wk"])],
        axis=1).astype(jnp.bfloat16)
    b_fused = jnp.concatenate(
        [pad_b(params["be"]), pad_b(params["bq"]), pad_b(params["bk"])], axis=1)

    # NOTE: the reference forward only ever uses self.gnn_layers[0].
    wo, bo = params["lin_out"][0]
    wo_p = pad_w(wo).astype(jnp.bfloat16)
    bo_p = pad_b(bo)

    x_pad = jnp.pad(x.astype(jnp.float32), ((0, 0), (0, 0), (0, dp - D)))

    def edge_consts(edge_index, edge_weight, n_nodes):
        src = edge_index[0].astype(jnp.int32)
        dst = edge_index[1].astype(jnp.int32)
        oh_src = jax.nn.one_hot(src, n_nodes, dtype=jnp.bfloat16)      # (E, n)
        oh_dst = jax.nn.one_hot(dst, n_nodes, dtype=jnp.bfloat16)      # (E, n)
        oh_dst_t = jax.nn.one_hot(dst, n_nodes, dtype=jnp.float32).T   # (n, E)
        ea = edge_weight.reshape(-1, 1).astype(jnp.float32)            # (E, 1)
        return [oh_src, oh_dst, oh_dst_t, ea]

    node_counts = [N] + [a.shape[1] for a in assignment_list]

    inputs = [x_pad, w_fused, b_fused, wo_p, bo_p]
    inputs += edge_consts(edge_index_list[0], edge_weight_list[0], node_counts[0])
    for i in range(num_levels):
        n_high = node_counts[i + 1]
        # torch.nonzero(one-hot assignment).T == (arange, argmax(axis=1));
        # all-zero rows silently map to index 0 (same as before).
        high_index = jnp.argmax(assignment_list[i], axis=1)
        dup_index = jnp.argmax(reversed_assignment_list[i], axis=1)
        oh_pool = jax.nn.one_hot(high_index, n_high,
                                 dtype=jnp.bfloat16).T                 # (n_high, n_low)
        oh_dup = jax.nn.one_hot(dup_index, n_high, dtype=jnp.float32)  # (N, n_high)
        inputs += ([oh_pool]
                   + edge_consts(edge_index_list[i + 1],
                                 edge_weight_list[i + 1], n_high)
                   + [oh_dup])

    in_specs = ([pl.BlockSpec((1, N, dp), lambda b: (b, 0, 0))]
                + [_const_spec(a) for a in inputs[1:]])

    kern = functools.partial(_fhgnn_forward_kernel,
                             num_levels=num_levels, dp=dp, dim=D)
    out = pl.pallas_call(
        kern,
        grid=(B,),
        in_specs=in_specs,
        out_specs=pl.BlockSpec((1, N, dp), lambda b: (b, 0, 0)),
        out_shape=jax.ShapeDtypeStruct((B, N, dp), jnp.float32),
        compiler_params=pltpu.CompilerParams(dimension_semantics=("parallel",)),
    )(*inputs)
    return out[:, :, :D]


# ---------------------------------------------------------------------------
# Pure-JAX f32 reference (direct port of the PyTorch module) for validation.
# ---------------------------------------------------------------------------
def _reference_forward(params, x, assignment_list, reversed_assignment_list,
                       edge_index_list, edge_weight_list):
    def layer(xx, hq, hk, edge_index, edge_attr, wo, bo):
        D = xx.shape[-1]
        src, dst = edge_index[0], edge_index[1]
        hq_g = hq[:, src, :]
        hk_g = hk[:, dst, :]
        sim = jnp.sum(hq_g * hk_g, axis=-1, keepdims=True) / jnp.sqrt(jnp.float32(D))
        logits = edge_attr.reshape(1, -1, 1) * sim
        w = jax.nn.softmax(logits, axis=1)
        msgs = w * xx[:, src, :]
        aggr = jnp.zeros_like(xx).at[:, dst, :].add(msgs)
        return jax.nn.relu(aggr @ wo + bo)

    h = x @ params["we"] + params["be"]
    h_q = x @ params["wq"] + params["bq"]
    h_k = x @ params["wk"] + params["bk"]
    wo, bo = params["lin_out"][0]
    h_prime = x + h
    h_prime = h_prime + layer(h, h_q, h_k, edge_index_list[0],
                              edge_weight_list[0], wo, bo)
    for i in range(len(assignment_list)):
        n_high = assignment_list[i].shape[1]
        high_index = jnp.argmax(assignment_list[i], axis=1)
        dup_index = jnp.argmax(reversed_assignment_list[i], axis=1)

        def pool(v):
            z = jnp.zeros((v.shape[0], n_high, v.shape[2]), v.dtype)
            return z.at[:, high_index, :].add(v)

        h, h_q, h_k = pool(h), pool(h_q), pool(h_k)
        h_hat = layer(h, h_q, h_k, edge_index_list[i + 1],
                      edge_weight_list[i + 1], wo, bo)
        h_prime = h_prime + h_hat[:, dup_index, :]
    return h_prime


# ---------------------------------------------------------------------------
if __name__ == "__main__":
    key = jax.random.PRNGKey(0)
    keys = jax.random.split(key, 16)

    B, N, D = 2, 16, 32
    num_levels = 2
    node_counts = [N, 8, 4]          # level-0 graph has N nodes, then 8, then 4
    edge_counts = [32, 16, 8]

    x = jax.random.normal(keys[0], (B, N, D), jnp.float32)
    scale = 1.0 / jnp.sqrt(jnp.float32(D))

    def make_linear(k):
        kw, kb = jax.random.split(k)
        # weights stored as [in, out] (already transposed vs. torch's [out, in])
        return (jax.random.normal(kw, (D, D), jnp.float32) * scale,
                jax.random.normal(kb, (D,), jnp.float32) * scale)

    we, be = make_linear(keys[1])
    wq, bq = make_linear(keys[2])
    wk, bk = make_linear(keys[3])
    lin_out = [make_linear(keys[4 + i]) for i in range(num_levels)]
    params = dict(we=we, be=be, wq=wq, bq=bq, wk=wk, bk=bk, lin_out=lin_out)

    edge_index_list = []
    edge_weight_list = []
    for lvl in range(num_levels + 1):
        ke = jax.random.fold_in(keys[8], lvl)
        ks, kd, kw_ = jax.random.split(ke, 3)
        n_lvl, e_lvl = node_counts[lvl], edge_counts[lvl]
        src = jax.random.randint(ks, (e_lvl,), 0, n_lvl, jnp.int32)
        dst = jax.random.randint(kd, (e_lvl,), 0, n_lvl, jnp.int32)
        edge_index_list.append(jnp.stack([src, dst], axis=0))
        edge_weight_list.append(jax.random.uniform(kw_, (e_lvl,), jnp.float32))

    # one-hot assignment matrices: node j at a level maps to high node j // 2
    assignment_list = []
    reversed_assignment_list = []
    for i in range(num_levels):
        n_low, n_high = node_counts[i], node_counts[i + 1]
        assignment_list.append(
            jax.nn.one_hot(jnp.arange(n_low) // 2, n_high, dtype=jnp.float32))
        reversed_assignment_list.append(
            jax.nn.one_hot(jnp.arange(N) * n_high // N, n_high, dtype=jnp.float32))

    fwd = jax.jit(fhgnn_forward)
    out = jax.block_until_ready(
        fwd(params, x, assignment_list, reversed_assignment_list,
            edge_index_list, edge_weight_list))

    ref = _reference_forward(params, x, assignment_list,
                             reversed_assignment_list,
                             edge_index_list, edge_weight_list)

    assert out.shape == (B, N, D)
    assert bool(jnp.all(jnp.isfinite(out)))
    max_err = float(jnp.max(jnp.abs(out - ref)))
    assert max_err < 0.25, f"max abs error vs f32 reference: {max_err}"
    print("KERNEL_OK")
</pallas_src>

<mosaic_0001>
module attributes {stable_mosaic.version = 11 : i64} {
  func.func @_fhgnn_forward_kernel(%arg0: i32, %arg1: memref<1x16x128xf32, #tpu.memory_space<vmem>>, %arg2: memref<128x384xbf16, #tpu.memory_space<vmem>>, %arg3: memref<1x384xf32, #tpu.memory_space<vmem>>, %arg4: memref<128x128xbf16, #tpu.memory_space<vmem>>, %arg5: memref<1x128xf32, #tpu.memory_space<vmem>>, %arg6: memref<32x16xbf16, #tpu.memory_space<vmem>>, %arg7: memref<32x16xbf16, #tpu.memory_space<vmem>>, %arg8: memref<16x32xf32, #tpu.memory_space<vmem>>, %arg9: memref<32x1xf32, #tpu.memory_space<vmem>>, %arg10: memref<8x16xbf16, #tpu.memory_space<vmem>>, %arg11: memref<16x8xbf16, #tpu.memory_space<vmem>>, %arg12: memref<16x8xbf16, #tpu.memory_space<vmem>>, %arg13: memref<8x16xf32, #tpu.memory_space<vmem>>, %arg14: memref<16x1xf32, #tpu.memory_space<vmem>>, %arg15: memref<16x8xf32, #tpu.memory_space<vmem>>, %arg16: memref<4x8xbf16, #tpu.memory_space<vmem>>, %arg17: memref<8x4xbf16, #tpu.memory_space<vmem>>, %arg18: memref<8x4xbf16, #tpu.memory_space<vmem>>, %arg19: memref<4x8xf32, #tpu.memory_space<vmem>>, %arg20: memref<8x1xf32, #tpu.memory_space<vmem>>, %arg21: memref<16x4xf32, #tpu.memory_space<vmem>>, %arg22: memref<1x16x128xf32, #tpu.memory_space<vmem>>) attributes {dimension_semantics = [#tpu.dimension_semantics<parallel>], iteration_bounds = array<i64: 2>, scalar_prefetch = 0 : i64, scratch_operands = 0 : i64, tpu.core_type = #tpu.core_type<tc>, window_params = [{transform_indices = @transform_0, window_bounds = array<i64: 1, 16, 128>}, {pipeline_mode = #tpu.pipeline_mode<synchronous>, transform_indices = @transform_1, window_bounds = array<i64: 128, 384>}, {pipeline_mode = #tpu.pipeline_mode<synchronous>, transform_indices = @transform_2, window_bounds = array<i64: 1, 384>}, {pipeline_mode = #tpu.pipeline_mode<synchronous>, transform_indices = @transform_3, window_bounds = array<i64: 128, 128>}, {pipeline_mode = #tpu.pipeline_mode<synchronous>, transform_indices = @transform_4, window_bounds = array<i64: 1, 128>}, {pipeline_mode = #tpu.pipeline_mode<synchronous>, transform_indices = @transform_5, window_bounds = array<i64: 32, 16>}, {pipeline_mode = #tpu.pipeline_mode<synchronous>, transform_indices = @transform_6, window_bounds = array<i64: 32, 16>}, {pipeline_mode = #tpu.pipeline_mode<synchronous>, transform_indices = @transform_7, window_bounds = array<i64: 16, 32>}, {pipeline_mode = #tpu.pipeline_mode<synchronous>, transform_indices = @transform_8, window_bounds = array<i64: 32, 1>}, {pipeline_mode = #tpu.pipeline_mode<synchronous>, transform_indices = @transform_9, window_bounds = array<i64: 8, 16>}, {pipeline_mode = #tpu.pipeline_mode<synchronous>, transform_indices = @transform_10, window_bounds = array<i64: 16, 8>}, {pipeline_mode = #tpu.pipeline_mode<synchronous>, transform_indices = @transform_11, window_bounds = array<i64: 16, 8>}, {pipeline_mode = #tpu.pipeline_mode<synchronous>, transform_indices = @transform_12, window_bounds = array<i64: 8, 16>}, {pipeline_mode = #tpu.pipeline_mode<synchronous>, transform_indices = @transform_13, window_bounds = array<i64: 16, 1>}, {pipeline_mode = #tpu.pipeline_mode<synchronous>, transform_indices = @transform_14, window_bounds = array<i64: 16, 8>}, {pipeline_mode = #tpu.pipeline_mode<synchronous>, transform_indices = @transform_15, window_bounds = array<i64: 4, 8>}, {pipeline_mode = #tpu.pipeline_mode<synchronous>, transform_indices = @transform_16, window_bounds = array<i64: 8, 4>}, {pipeline_mode = #tpu.pipeline_mode<synchronous>, transform_indices = @transform_17, window_bounds = array<i64: 8, 4>}, {pipeline_mode = #tpu.pipeline_mode<synchronous>, transform_indices = @transform_18, window_bounds = array<i64: 4, 8>}, {pipeline_mode = #tpu.pipeline_mode<synchronous>, transform_indices = @transform_19, window_bounds = array<i64: 8, 1>}, {pipeline_mode = #tpu.pipeline_mode<synchronous>, transform_indices = @transform_20, window_bounds = array<i64: 16, 4>}, {transform_indices = @transform_21, window_bounds = array<i64: 1, 16, 128>}]} {
    %c0 = arith.constant 0 : index
    %c0_0 = arith.constant 0 : index
    %0 = vector.load %arg4[%c0, %c0_0] : memref<128x128xbf16, #tpu.memory_space<vmem>>, vector<128x128xbf16>
    %c0_1 = arith.constant 0 : index
    %c0_2 = arith.constant 0 : index
    %1 = vector.load %arg5[%c0_1, %c0_2] : memref<1x128xf32, #tpu.memory_space<vmem>>, vector<1x128xf32>
    %c0_3 = arith.constant 0 : index
    %c0_4 = arith.constant 0 : index
    %c0_5 = arith.constant 0 : index
    %2 = vector.load %arg1[%c0_3, %c0_4, %c0_5] : memref<1x16x128xf32, #tpu.memory_space<vmem>>, vector<1x16x128xf32>
    %3 = vector.shape_cast %2 : vector<1x16x128xf32> to vector<16x128xf32>
    %4 = arith.truncf %3 : vector<16x128xf32> to vector<16x128xbf16>
    %c0_6 = arith.constant 0 : index
    %c0_7 = arith.constant 0 : index
    %5 = vector.load %arg2[%c0_6, %c0_7] : memref<128x384xbf16, #tpu.memory_space<vmem>>, vector<128x384xbf16>
    %cst = arith.constant dense<0.000000e+00> : vector<16x384xf32>
    %6 = tpu.matmul %4, %5, %cst {dimension_numbers = #tpu.dot_dimension_numbers<[1], [0], [0], [1], [0, 0, 1, 1], [], []>} : vector<16x128xbf16>, vector<128x384xbf16>, vector<16x384xf32> -> vector<16x384xf32>
    %c0_8 = arith.constant 0 : index
    %c0_9 = arith.constant 0 : index
    %7 = vector.load %arg3[%c0_8, %c0_9] : memref<1x384xf32, #tpu.memory_space<vmem>>, vector<1x384xf32>
    %8 = vector.broadcast %7 : vector<1x384xf32> to vector<16x384xf32>
    %9 = arith.addf %6, %8 : vector<16x384xf32>
    %10 = arith.truncf %9 : vector<16x384xf32> to vector<16x384xbf16>
    %11 = vector.extract_strided_slice %9 {offsets = [0, 0], sizes = [16, 128], strides = [1, 1]} : vector<16x384xf32> to vector<16x128xf32>
    %12 = arith.addf %3, %11 : vector<16x128xf32>
    %c0_10 = arith.constant 0 : index
    %c0_11 = arith.constant 0 : index
    %13 = vector.load %arg6[%c0_10, %c0_11] : memref<32x16xbf16, #tpu.memory_space<vmem>>, vector<32x16xbf16>
    %c0_12 = arith.constant 0 : index
    %c0_13 = arith.constant 0 : index
    %14 = vector.load %arg7[%c0_12, %c0_13] : memref<32x16xbf16, #tpu.memory_space<vmem>>, vector<32x16xbf16>
    %c0_14 = arith.constant 0 : index
    %c0_15 = arith.constant 0 : index
    %15 = vector.load %arg8[%c0_14, %c0_15] : memref<16x32xf32, #tpu.memory_space<vmem>>, vector<16x32xf32>
    %c0_16 = arith.constant 0 : index
    %c0_17 = arith.constant 0 : index
    %16 = vector.load %arg9[%c0_16, %c0_17] : memref<32x1xf32, #tpu.memory_space<vmem>>, vector<32x1xf32>
    %17 = vector.extract_strided_slice %10 {offsets = [0, 0], sizes = [16, 256], strides = [1, 1]} : vector<16x384xbf16> to vector<16x256xbf16>
    %cst_18 = arith.constant dense<0.000000e+00> : vector<32x256xf32>
    %18 = tpu.matmul %13, %17, %cst_18 {dimension_numbers = #tpu.dot_dimension_numbers<[1], [0], [0], [1], [0, 0, 1, 1], [], []>} : vector<32x16xbf16>, vector<16x256xbf16>, vector<32x256xf32> -> vector<32x256xf32>
    %19 = vector.extract_strided_slice %18 {offsets = [0, 0], sizes = [32, 128], strides = [1, 1]} : vector<32x256xf32> to vector<32x128xf32>
    %20 = vector.extract_strided_slice %18 {offsets = [0, 128], sizes = [32, 128], strides = [1, 1]} : vector<32x256xf32> to vector<32x128xf32>
    %21 = vector.extract_strided_slice %10 {offsets = [0, 256], sizes = [16, 128], strides = [1, 1]} : vector<16x384xbf16> to vector<16x128xbf16>
    %cst_19 = arith.constant dense<0.000000e+00> : vector<32x128xf32>
    %22 = tpu.matmul %14, %21, %cst_19 {dimension_numbers = #tpu.dot_dimension_numbers<[1], [0], [0], [1], [0, 0, 1, 1], [], []>} : vector<32x16xbf16>, vector<16x128xbf16>, vector<32x128xf32> -> vector<32x128xf32>
    %23 = arith.mulf %20, %22 : vector<32x128xf32>
    %cst_20 = arith.constant dense<0.000000e+00> : vector<32xf32>
    %24 = vector.multi_reduction <add>, %23, %cst_20 [1] : vector<32x128xf32> to vector<32xf32>
    %25 = vector.shape_cast %24 : vector<32xf32> to vector<32x1xf32>
    %cst_21 = arith.constant 0.176776692 : f32
    %26 = vector.broadcast %cst_21 : f32 to vector<32x1xf32>
    %27 = arith.mulf %25, %26 : vector<32x1xf32>
    %28 = arith.mulf %16, %27 : vector<32x1xf32>
    %cst_22 = arith.constant dense<0xFF800000> : vector<1xf32>
    %29 = vector.multi_reduction <maximumf>, %28, %cst_22 [0] : vector<32x1xf32> to vector<1xf32>
    %30 = vector.shape_cast %29 : vector<1xf32> to vector<1x1xf32>
    %31 = vector.broadcast %30 : vector<1x1xf32> to vector<32x1xf32>
    %32 = arith.subf %28, %31 : vector<32x1xf32>
    %33 = math.exp %32 : vector<32x1xf32>
    %cst_23 = arith.constant dense<0.000000e+00> : vector<1xf32>
    %34 = vector.multi_reduction <add>, %33, %cst_23 [0] : vector<32x1xf32> to vector<1xf32>
    %35 = vector.shape_cast %34 : vector<1xf32> to vector<1x1xf32>
    %36 = vector.broadcast %35 : vector<1x1xf32> to vector<32x1xf32>
    %37 = arith.divf %33, %36 : vector<32x1xf32>
    %38 = vector.broadcast %37 : vector<32x1xf32> to vector<32x128xf32>
    %39 = arith.mulf %38, %19 : vector<32x128xf32>
    %cst_24 = arith.constant dense<0.000000e+00> : vector<16x128xf32>
    %40 = tpu.matmul %15, %39, %cst_24 {dimension_numbers = #tpu.dot_dimension_numbers<[1], [0], [0], [1], [0, 0, 1, 1], [], []>} : vector<16x32xf32>, vector<32x128xf32>, vector<16x128xf32> -> vector<16x128xf32>
    %41 = arith.truncf %40 : vector<16x128xf32> to vector<16x128xbf16>
    %cst_25 = arith.constant dense<0.000000e+00> : vector<16x128xf32>
    %42 = tpu.matmul %41, %0, %cst_25 {dimension_numbers = #tpu.dot_dimension_numbers<[1], [0], [0], [1], [0, 0, 1, 1], [], []>} : vector<16x128xbf16>, vector<128x128xbf16>, vector<16x128xf32> -> vector<16x128xf32>
    %43 = vector.broadcast %1 : vector<1x128xf32> to vector<16x128xf32>
    %44 = arith.addf %42, %43 : vector<16x128xf32>
    %cst_26 = arith.constant 0.000000e+00 : f32
    %45 = vector.broadcast %cst_26 : f32 to vector<16x128xf32>
    %46 = arith.maximumf %44, %45 : vector<16x128xf32>
    %47 = arith.addf %12, %46 : vector<16x128xf32>
    %c0_27 = arith.constant 0 : index
    %c0_28 = arith.constant 0 : index
    %48 = vector.load %arg10[%c0_27, %c0_28] : memref<8x16xbf16, #tpu.memory_space<vmem>>, vector<8x16xbf16>
    %cst_29 = arith.constant dense<0.000000e+00> : vector<8x384xf32>
    %49 = tpu.matmul %48, %10, %cst_29 {dimension_numbers = #tpu.dot_dimension_numbers<[1], [0], [0], [1], [0, 0, 1, 1], [], []>} : vector<8x16xbf16>, vector<16x384xbf16>, vector<8x384xf32> -> vector<8x384xf32>
    %50 = arith.truncf %49 : vector<8x384xf32> to vector<8x384xbf16>
    %c0_30 = arith.constant 0 : index
    %c0_31 = arith.constant 0 : index
    %51 = vector.load %arg11[%c0_30, %c0_31] : memref<16x8xbf16, #tpu.memory_space<vmem>>, vector<16x8xbf16>
    %c0_32 = arith.constant 0 : index
    %c0_33 = arith.constant 0 : index
    %52 = vector.load %arg12[%c0_32, %c0_33] : memref<16x8xbf16, #tpu.memory_space<vmem>>, vector<16x8xbf16>
    %c0_34 = arith.constant 0 : index
    %c0_35 = arith.constant 0 : index
    %53 = vector.load %arg13[%c0_34, %c0_35] : memref<8x16xf32, #tpu.memory_space<vmem>>, vector<8x16xf32>
    %c0_36 = arith.constant 0 : index
    %c0_37 = arith.constant 0 : index
    %54 = vector.load %arg14[%c0_36, %c0_37] : memref<16x1xf32, #tpu.memory_space<vmem>>, vector<16x1xf32>
    %55 = vector.extract_strided_slice %50 {offsets = [0, 0], sizes = [8, 256], strides = [1, 1]} : vector<8x384xbf16> to vector<8x256xbf16>
    %cst_38 = arith.constant dense<0.000000e+00> : vector<16x256xf32>
    %56 = tpu.matmul %51, %55, %cst_38 {dimension_numbers = #tpu.dot_dimension_numbers<[1], [0], [0], [1], [0, 0, 1, 1], [], []>} : vector<16x8xbf16>, vector<8x256xbf16>, vector<16x256xf32> -> vector<16x256xf32>
    %57 = vector.extract_strided_slice %56 {offsets = [0, 0], sizes = [16, 128], strides = [1, 1]} : vector<16x256xf32> to vector<16x128xf32>
    %58 = vector.extract_strided_slice %56 {offsets = [0, 128], sizes = [16, 128], strides = [1, 1]} : vector<16x256xf32> to vector<16x128xf32>
    %59 = vector.extract_strided_slice %50 {offsets = [0, 256], sizes = [8, 128], strides = [1, 1]} : vector<8x384xbf16> to vector<8x128xbf16>
    %cst_39 = arith.constant dense<0.000000e+00> : vector<16x128xf32>
    %60 = tpu.matmul %52, %59, %cst_39 {dimension_numbers = #tpu.dot_dimension_numbers<[1], [0], [0], [1], [0, 0, 1, 1], [], []>} : vector<16x8xbf16>, vector<8x128xbf16>, vector<16x128xf32> -> vector<16x128xf32>
    %61 = arith.mulf %58, %60 : vector<16x128xf32>
    %cst_40 = arith.constant dense<0.000000e+00> : vector<16xf32>
    %62 = vector.multi_reduction <add>, %61, %cst_40 [1] : vector<16x128xf32> to vector<16xf32>
    %63 = vector.shape_cast %62 : vector<16xf32> to vector<16x1xf32>
    %cst_41 = arith.constant 0.176776692 : f32
    %64 = vector.broadcast %cst_41 : f32 to vector<16x1xf32>
    %65 = arith.mulf %63, %64 : vector<16x1xf32>
    %66 = arith.mulf %54, %65 : vector<16x1xf32>
    %cst_42 = arith.constant dense<0xFF800000> : vector<1xf32>
    %67 = vector.multi_reduction <maximumf>, %66, %cst_42 [0] : vector<16x1xf32> to vector<1xf32>
    %68 = vector.shape_cast %67 : vector<1xf32> to vector<1x1xf32>
    %69 = vector.broadcast %68 : vector<1x1xf32> to vector<16x1xf32>
    %70 = arith.subf %66, %69 : vector<16x1xf32>
    %71 = math.exp %70 : vector<16x1xf32>
    %cst_43 = arith.constant dense<0.000000e+00> : vector<1xf32>
    %72 = vector.multi_reduction <add>, %71, %cst_43 [0] : vector<16x1xf32> to vector<1xf32>
    %73 = vector.shape_cast %72 : vector<1xf32> to vector<1x1xf32>
    %74 = vector.broadcast %73 : vector<1x1xf32> to vector<16x1xf32>
    %75 = arith.divf %71, %74 : vector<16x1xf32>
    %76 = vector.broadcast %75 : vector<16x1xf32> to vector<16x128xf32>
    %77 = arith.mulf %76, %57 : vector<16x128xf32>
    %cst_44 = arith.constant dense<0.000000e+00> : vector<8x128xf32>
    %78 = tpu.matmul %53, %77, %cst_44 {dimension_numbers = #tpu.dot_dimension_numbers<[1], [0], [0], [1], [0, 0, 1, 1], [], []>} : vector<8x16xf32>, vector<16x128xf32>, vector<8x128xf32> -> vector<8x128xf32>
    %79 = arith.truncf %78 : vector<8x128xf32> to vector<8x128xbf16>
    %cst_45 = arith.constant dense<0.000000e+00> : vector<8x128xf32>
    %80 = tpu.matmul %79, %0, %cst_45 {dimension_numbers = #tpu.dot_dimension_numbers<[1], [0], [0], [1], [0, 0, 1, 1], [], []>} : vector<8x128xbf16>, vector<128x128xbf16>, vector<8x128xf32> -> vector<8x128xf32>
    %81 = vector.broadcast %1 : vector<1x128xf32> to vector<8x128xf32>
    %82 = arith.addf %80, %81 : vector<8x128xf32>
    %cst_46 = arith.constant 0.000000e+00 : f32
    %83 = vector.broadcast %cst_46 : f32 to vector<8x128xf32>
    %84 = arith.maximumf %82, %83 : vector<8x128xf32>
    %c0_47 = arith.constant 0 : index
    %c0_48 = arith.constant 0 : index
    %85 = vector.load %arg15[%c0_47, %c0_48] : memref<16x8xf32, #tpu.memory_space<vmem>>, vector<16x8xf32>
    %cst_49 = arith.constant dense<0.000000e+00> : vector<16x128xf32>
    %86 = tpu.matmul %85, %84, %cst_49 {dimension_numbers = #tpu.dot_dimension_numbers<[1], [0], [0], [1], [0, 0, 1, 1], [], []>} : vector<16x8xf32>, vector<8x128xf32>, vector<16x128xf32> -> vector<16x128xf32>
    %87 = arith.addf %47, %86 : vector<16x128xf32>
    %c0_50 = arith.constant 0 : index
    %c0_51 = arith.constant 0 : index
    %88 = vector.load %arg16[%c0_50, %c0_51] : memref<4x8xbf16, #tpu.memory_space<vmem>>, vector<4x8xbf16>
    %cst_52 = arith.constant dense<0.000000e+00> : vector<4x384xf32>
    %89 = tpu.matmul %88, %50, %cst_52 {dimension_numbers = #tpu.dot_dimension_numbers<[1], [0], [0], [1], [0, 0, 1, 1], [], []>} : vector<4x8xbf16>, vector<8x384xbf16>, vector<4x384xf32> -> vector<4x384xf32>
    %90 = arith.truncf %89 : vector<4x384xf32> to vector<4x384xbf16>
    %c0_53 = arith.constant 0 : index
    %c0_54 = arith.constant 0 : index
    %91 = vector.load %arg17[%c0_53, %c0_54] : memref<8x4xbf16, #tpu.memory_space<vmem>>, vector<8x4xbf16>
    %c0_55 = arith.constant 0 : index
    %c0_56 = arith.constant 0 : index
    %92 = vector.load %arg18[%c0_55, %c0_56] : memref<8x4xbf16, #tpu.memory_space<vmem>>, vector<8x4xbf16>
    %c0_57 = arith.constant 0 : index
    %c0_58 = arith.constant 0 : index
    %93 = vector.load %arg19[%c0_57, %c0_58] : memref<4x8xf32, #tpu.memory_space<vmem>>, vector<4x8xf32>
    %c0_59 = arith.constant 0 : index
    %c0_60 = arith.constant 0 : index
    %94 = vector.load %arg20[%c0_59, %c0_60] : memref<8x1xf32, #tpu.memory_space<vmem>>, vector<8x1xf32>
    %95 = vector.extract_strided_slice %90 {offsets = [0, 0], sizes = [4, 256], strides = [1, 1]} : vector<4x384xbf16> to vector<4x256xbf16>
    %cst_61 = arith.constant dense<0.000000e+00> : vector<8x256xf32>
    %96 = tpu.matmul %91, %95, %cst_61 {dimension_numbers = #tpu.dot_dimension_numbers<[1], [0], [0], [1], [0, 0, 1, 1], [], []>} : vector<8x4xbf16>, vector<4x256xbf16>, vector<8x256xf32> -> vector<8x256xf32>
    %97 = vector.extract_strided_slice %96 {offsets = [0, 0], sizes = [8, 128], strides = [1, 1]} : vector<8x256xf32> to vector<8x128xf32>
    %98 = vector.extract_strided_slice %96 {offsets = [0, 128], sizes = [8, 128], strides = [1, 1]} : vector<8x256xf32> to vector<8x128xf32>
    %99 = vector.extract_strided_slice %90 {offsets = [0, 256], sizes = [4, 128], strides = [1, 1]} : vector<4x384xbf16> to vector<4x128xbf16>
    %cst_62 = arith.constant dense<0.000000e+00> : vector<8x128xf32>
    %100 = tpu.matmul %92, %99, %cst_62 {dimension_numbers = #tpu.dot_dimension_numbers<[1], [0], [0], [1], [0, 0, 1, 1], [], []>} : vector<8x4xbf16>, vector<4x128xbf16>, vector<8x128xf32> -> vector<8x128xf32>
    %101 = arith.mulf %98, %100 : vector<8x128xf32>
    %cst_63 = arith.constant dense<0.000000e+00> : vector<8xf32>
    %102 = vector.multi_reduction <add>, %101, %cst_63 [1] : vector<8x128xf32> to vector<8xf32>
    %103 = vector.shape_cast %102 : vector<8xf32> to vector<8x1xf32>
    %cst_64 = arith.constant 0.176776692 : f32
    %104 = vector.broadcast %cst_64 : f32 to vector<8x1xf32>
    %105 = arith.mulf %103, %104 : vector<8x1xf32>
    %106 = arith.mulf %94, %105 : vector<8x1xf32>
    %cst_65 = arith.constant dense<0xFF800000> : vector<1xf32>
    %107 = vector.multi_reduction <maximumf>, %106, %cst_65 [0] : vector<8x1xf32> to vector<1xf32>
    %108 = vector.shape_cast %107 : vector<1xf32> to vector<1x1xf32>
    %109 = vector.broadcast %108 : vector<1x1xf32> to vector<8x1xf32>
    %110 = arith.subf %106, %109 : vector<8x1xf32>
    %111 = math.exp %110 : vector<8x1xf32>
    %cst_66 = arith.constant dense<0.000000e+00> : vector<1xf32>
    %112 = vector.multi_reduction <add>, %111, %cst_66 [0] : vector<8x1xf32> to vector<1xf32>
    %113 = vector.shape_cast %112 : vector<1xf32> to vector<1x1xf32>
    %114 = vector.broadcast %113 : vector<1x1xf32> to vector<8x1xf32>
    %115 = arith.divf %111, %114 : vector<8x1xf32>
    %116 = vector.broadcast %115 : vector<8x1xf32> to vector<8x128xf32>
    %117 = arith.mulf %116, %97 : vector<8x128xf32>
    %cst_67 = arith.constant dense<0.000000e+00> : vector<4x128xf32>
    %118 = tpu.matmul %93, %117, %cst_67 {dimension_numbers = #tpu.dot_dimension_numbers<[1], [0], [0], [1], [0, 0, 1, 1], [], []>} : vector<4x8xf32>, vector<8x128xf32>, vector<4x128xf32> -> vector<4x128xf32>
    %119 = arith.truncf %118 : vector<4x128xf32> to vector<4x128xbf16>
    %cst_68 = arith.constant dense<0.000000e+00> : vector<4x128xf32>
    %120 = tpu.matmul %119, %0, %cst_68 {dimension_numbers = #tpu.dot_dimension_numbers<[1], [0], [0], [1], [0, 0, 1, 1], [], []>} : vector<4x128xbf16>, vector<128x128xbf16>, vector<4x128xf32> -> vector<4x128xf32>
    %121 = vector.broadcast %1 : vector<1x128xf32> to vector<4x128xf32>
    %122 = arith.addf %120, %121 : vector<4x128xf32>
    %cst_69 = arith.constant 0.000000e+00 : f32
    %123 = vector.broadcast %cst_69 : f32 to vector<4x128xf32>
    %124 = arith.maximumf %122, %123 : vector<4x128xf32>
    %c0_70 = arith.constant 0 : index
    %c0_71 = arith.constant 0 : index
    %125 = vector.load %arg21[%c0_70, %c0_71] : memref<16x4xf32, #tpu.memory_space<vmem>>, vector<16x4xf32>
    %cst_72 = arith.constant dense<0.000000e+00> : vector<16x128xf32>
    %126 = tpu.matmul %125, %124, %cst_72 {dimension_numbers = #tpu.dot_dimension_numbers<[1], [0], [0], [1], [0, 0, 1, 1], [], []>} : vector<16x4xf32>, vector<4x128xf32>, vector<16x128xf32> -> vector<16x128xf32>
    %127 = arith.addf %87, %126 : vector<16x128xf32>
    %c0_73 = arith.constant 0 : index
    %c0_74 = arith.constant 0 : index
    %c0_75 = arith.constant 0 : index
    %128 = vector.load %arg22[%c0_73, %c0_74, %c0_75] : memref<1x16x128xf32, #tpu.memory_space<vmem>>, vector<1x16x128xf32>
    %129 = vector.shape_cast %128 : vector<1x16x128xf32> to vector<16x128xf32>
    %130 = vector.shape_cast %127 : vector<16x128xf32> to vector<1x16x128xf32>
    tpu.vector_store %arg22[%c0_73, %c0_74, %c0_75], %130 {strides = array<i32>} : memref<1x16x128xf32, #tpu.memory_space<vmem>>, vector<1x16x128xf32>,
    return
  }
  func.func @transform_0(%arg0: i32) -> (i32, i32, i32) {
    %c0_i32 = arith.constant 0 : i32
    %c0_i32_0 = arith.constant 0 : i32
    %c0_i32_1 = arith.constant 0 : i32
    return %arg0, %c0_i32, %c0_i32_0 : i32, i32, i32
  }
  func.func @transform_1(%arg0: i32) -> (i32, i32) {
    %c0_i32 = arith.constant 0 : i32
    %c0_i32_0 = arith.constant 0 : i32
    %c0_i32_1 = arith.constant 0 : i32
    return %c0_i32, %c0_i32_0 : i32, i32
  }
  func.func @transform_2(%arg0: i32) -> (i32, i32) {
    %c0_i32 = arith.constant 0 : i32
    %c0_i32_0 = arith.constant 0 : i32
    %c0_i32_1 = arith.constant 0 : i32
    return %c0_i32, %c0_i32_0 : i32, i32
  }
  func.func @transform_3(%arg0: i32) -> (i32, i32) {
    %c0_i32 = arith.constant 0 : i32
    %c0_i32_0 = arith.constant 0 : i32
    %c0_i32_1 = arith.constant 0 : i32
    return %c0_i32, %c0_i32_0 : i32, i32
  }
  func.func @transform_4(%arg0: i32) -> (i32, i32) {
    %c0_i32 = arith.constant 0 : i32
    %c0_i32_0 = arith.constant 0 : i32
    %c0_i32_1 = arith.constant 0 : i32
    return %c0_i32, %c0_i32_0 : i32, i32
  }
  func.func @transform_5(%arg0: i32) -> (i32, i32) {
    %c0_i32 = arith.constant 0 : i32
    %c0_i32_0 = arith.constant 0 : i32
    %c0_i32_1 = arith.constant 0 : i32
    return %c0_i32, %c0_i32_0 : i32, i32
  }
  func.func @transform_6(%arg0: i32) -> (i32, i32) {
    %c0_i32 = arith.constant 0 : i32
    %c0_i32_0 = arith.constant 0 : i32
    %c0_i32_1 = arith.constant 0 : i32
    return %c0_i32, %c0_i32_0 : i32, i32
  }
  func.func @transform_7(%arg0: i32) -> (i32, i32) {
    %c0_i32 = arith.constant 0 : i32
    %c0_i32_0 = arith.constant 0 : i32
    %c0_i32_1 = arith.constant 0 : i32
    return %c0_i32, %c0_i32_0 : i32, i32
  }
  func.func @transform_8(%arg0: i32) -> (i32, i32) {
    %c0_i32 = arith.constant 0 : i32
    %c0_i32_0 = arith.constant 0 : i32
    %c0_i32_1 = arith.constant 0 : i32
    return %c0_i32, %c0_i32_0 : i32, i32
  }
  func.func @transform_9(%arg0: i32) -> (i32, i32) {
    %c0_i32 = arith.constant 0 : i32
    %c0_i32_0 = arith.constant 0 : i32
    %c0_i32_1 = arith.constant 0 : i32
    return %c0_i32, %c0_i32_0 : i32, i32
  }
  func.func @transform_10(%arg0: i32) -> (i32, i32) {
    %c0_i32 = arith.constant 0 : i32
    %c0_i32_0 = arith.constant 0 : i32
    %c0_i32_1 = arith.constant 0 : i32
    return %c0_i32, %c0_i32_0 : i32, i32
  }
  func.func @transform_11(%arg0: i32) -> (i32, i32) {
    %c0_i32 = arith.constant 0 : i32
    %c0_i32_0 = arith.constant 0 : i32
    %c0_i32_1 = arith.constant 0 : i32
    return %c0_i32, %c0_i32_0 : i32, i32
  }
  func.func @transform_12(%arg0: i32) -> (i32, i32) {
    %c0_i32 = arith.constant 0 : i32
    %c0_i32_0 = arith.constant 0 : i32
    %c0_i32_1 = arith.constant 0 : i32
    return %c0_i32, %c0_i32_0 : i32, i32
  }
  func.func @transform_13(%arg0: i32) -> (i32, i32) {
    %c0_i32 = arith.constant 0 : i32
    %c0_i32_0 = arith.constant 0 : i32
    %c0_i32_1 = arith.constant 0 : i32
    return %c0_i32, %c0_i32_0 : i32, i32
  }
  func.func @transform_14(%arg0: i32) -> (i32, i32) {
    %c0_i32 = arith.constant 0 : i32
    %c0_i32_0 = arith.constant 0 : i32
    %c0_i32_1 = arith.constant 0 : i32
    return %c0_i32, %c0_i32_0 : i32, i32
  }
  func.func @transform_15(%arg0: i32) -> (i32, i32) {
    %c0_i32 = arith.constant 0 : i32
    %c0_i32_0 = arith.constant 0 : i32
    %c0_i32_1 = arith.constant 0 : i32
    return %c0_i32, %c0_i32_0 : i32, i32
  }
  func.func @transform_16(%arg0: i32) -> (i32, i32) {
    %c0_i32 = arith.constant 0 : i32
    %c0_i32_0 = arith.constant 0 : i32
    %c0_i32_1 = arith.constant 0 : i32
    return %c0_i32, %c0_i32_0 : i32, i32
  }
  func.func @transform_17(%arg0: i32) -> (i32, i32) {
    %c0_i32 = arith.constant 0 : i32
    %c0_i32_0 = arith.constant 0 : i32
    %c0_i32_1 = arith.constant 0 : i32
    return %c0_i32, %c0_i32_0 : i32, i32
  }
  func.func @transform_18(%arg0: i32) -> (i32, i32) {
    %c0_i32 = arith.constant 0 : i32
    %c0_i32_0 = arith.constant 0 : i32
    %c0_i32_1 = arith.constant 0 : i32
    return %c0_i32, %c0_i32_0 : i32, i32
  }
  func.func @transform_19(%arg0: i32) -> (i32, i32) {
    %c0_i32 = arith.constant 0 : i32
    %c0_i32_0 = arith.constant 0 : i32
    %c0_i32_1 = arith.constant 0 : i32
    return %c0_i32, %c0_i32_0 : i32, i32
  }
  func.func @transform_20(%arg0: i32) -> (i32, i32) {
    %c0_i32 = arith.constant 0 : i32
    %c0_i32_0 = arith.constant 0 : i32
    %c0_i32_1 = arith.constant 0 : i32
    return %c0_i32, %c0_i32_0 : i32, i32
  }
  func.func @transform_21(%arg0: i32) -> (i32, i32, i32) {
    %c0_i32 = arith.constant 0 : i32
    %c0_i32_0 = arith.constant 0 : i32
    %c0_i32_1 = arith.constant 0 : i32
    return %arg0, %c0_i32, %c0_i32_0 : i32, i32, i32
  }
}

</mosaic_0001>

<bundles_post_ra>
// kernel: fhgnn_forward.1
= control target key start
LH: loop header
LB: loop body
LE: loop exit
PB: predicated region body
PF: predicated region fallthrough
CT: control target
= control target key end

     0   :  { %s3392_s0 = inlined_call_operand.vmem [shape: f32[2,16,128], index: 0, kind: input, shape index: {}]   ;;  %s3393_s1 = inlined_call_operand.vmem [shape: bf16[128,384], index: 1, kind: input, shape index: {}]   ;;  %s3394_s2 = inlined_call_operand.vmem [shape: f32[1,384], index: 2, kind: input, shape index: {}]   ;;  %s3395_s3 = inlined_call_operand.vmem [shape: bf16[128,128], index: 3, kind: input, shape index: {}]   ;;  %s3396_s4 = inlined_call_operand.vmem [shape: f32[1,128], index: 4, kind: input, shape index: {}]   ;;  %s3397_s5 = inlined_call_operand.vmem [shape: bf16[32,16], index: 5, kind: input, shape index: {}]   ;;  %s3398_s6 = inlined_call_operand.vmem [shape: bf16[32,16], index: 6, kind: input, shape index: {}]   ;;  %s3399_s7 = inlined_call_operand.vmem [shape: f32[16,32], index: 7, kind: input, shape index: {}]   ;;  %s3400_s8 = inlined_call_operand.vmem [shape: f32[32,1], index: 8, kind: input, shape index: {}]   ;;  %s3401_s9 = inlined_call_operand.vmem [shape: bf16[8,16], index: 9, kind: input, shape index: {}]   ;;  %s3402_s10 = inlined_call_operand.vmem [shape: bf16[16,8], index: 10, kind: input, shape index: {}]   ;;  %s3403_s11 = inlined_call_operand.vmem [shape: bf16[16,8], index: 11, kind: input, shape index: {}]   ;;  %s3404_s12 = inlined_call_operand.vmem [shape: f32[8,16], index: 12, kind: input, shape index: {}]   ;;  %s3405_s13 = inlined_call_operand.vmem [shape: f32[16,1], index: 13, kind: input, shape index: {}]   ;;  %s3406_s14 = inlined_call_operand.vmem [shape: f32[16,8], index: 14, kind: input, shape index: {}]   ;;  %s3407_s15 = inlined_call_operand.vmem [shape: bf16[4,8], index: 15, kind: input, shape index: {}]   ;;  %s3408_s16 = inlined_call_operand.vmem [shape: bf16[8,4], index: 16, kind: input, shape index: {}]   ;;  %s3409_s17 = inlined_call_operand.vmem [shape: bf16[8,4], index: 17, kind: input, shape index: {}]   ;;  %s3410_s18 = inlined_call_operand.vmem [shape: f32[4,8], index: 18, kind: input, shape index: {}]   ;;  %s3411_s19 = inlined_call_operand.vmem [shape: f32[8,1], index: 19, kind: input, shape index: {}]   ;;  %s3412_s20 = inlined_call_operand.vmem [shape: f32[16,4], index: 20, kind: input, shape index: {}]   ;;  %s3413_s21 = inlined_call_operand.hbm [shape: f32[2,16,128], index: 21, kind: output, shape index: {}]  }
   0x1   :  { %3425 = sst [smem:[#allocation11_spill]] %s3392_s0 }
   0x2   :  { %3426 = sst [smem:[#allocation12_spill]] %s3393_s1 }
   0x3   :  { %3427 = sst [smem:[#allocation13_spill]] %s3394_s2 }
   0x4   :  { %3428 = sst [smem:[#allocation14_spill]] %s3395_s3 }
   0x5   :  { %3429 = sst [smem:[#allocation15_spill]] %s3396_s4 }
   0x6   :  { %3430 = sst [smem:[#allocation16_spill]] %s3397_s5 }
   0x7   :  { %3431 = sst [smem:[#allocation17_spill]] %s3398_s6 }
   0x8   :  { %3432 = sst [smem:[#allocation18_spill]] %s3399_s7 }
   0x9   :  { %3433 = sst [smem:[#allocation19_spill]] %s3413_s21 }
   0xa   :  { %26 = vsyncpa [#allocation3], 0 }
   0xb   :  { %28 = vsyncpa [#allocation3 + $0x1], 0  ;;  %s2891_s2 = smov 0   ;;  %s2893_s25 = smov 0  }
   0xc   :  { %s2895_s26 = smov 0   ;;  %s2897_s27 = smov 0  }
   0xd LB: > { %3434 = sst [smem:[#allocation5_spill]] %s2761_s2  ;;  %s2912_s3 = sadd.s32 4294967295, %s2773_s27   ;;  %s2773_s27 = sphi %s2897_s27, %s3455_s27   ;;  %s2769_s26 = sphi %s2895_s26, %s3460_s26   ;;  %s2765_s25 = sphi %s2893_s25, %s3459_s25   ;;  %s2761_s2 = sphi %s2891_s2, %s3458_s2  }
   0xe   : > { %3435 = sst [smem:[#allocation6_spill]] %s2769_s26  ;;  %s2317_s28 = sadd.s32 4294967294, %s2773_s27  }
   0xf   : > { %3436 = sst [smem:[#allocation7_spill]] %s2773_s27  ;;  %s2916_s29 = sadd.s32 1, %s2773_s27  }
  0x10   : > { %3437 = sst [smem:[#allocation8_spill]] %s2916_s29  ;;  %s487_s0 = sadd.s32 1, %s2769_s26 }
  0x11   : > { %s484_s4 = ssub.s32 %s2773_s27, %s2916_s29  ;;  %p497_p0 = scmp.ne.s32.totalorder %s2769_s26, %s2765_s25 }
  0x12   : > { %p485_p1 = scmp.eq.s32.totalorder %s484_s4, 0  ;;  %p498_p2 = scmp.eq.s32.totalorder %s2912_s3, 1 }
  0x13   : > { %p503_p3 = scmp.ne.s32.totalorder %s2765_s25, %s2761_s2  ;;  %p504_p4 = scmp.eq.s32.totalorder %s2317_s28, 1 }
  0x14   : > { %s2927_s30 = scalar_select %p485_p1, %s2769_s26, %s487_s0  }
  0x15   : > { %p2929_p5 = por %p498_p2, %p497_p0  ;;  %p2933_p6 = por %p504_p4, %p503_p3 }
  0x16   : > { %3438 = sst [smem:[#allocation9_spill]] %s2927_s30  ;;  %p2320_p7 = scmp.ge.s32.totalorder %s2773_s27, 1 }
  0x17   : > { %s3440_s22 = scalar_select %p2933_p6, 1, 0 }
  0x18   : > { %p590_p8 = scmp.lt.s32.totalorder %s2773_s27, 3 }
  0x19   : > { %3441 = sst [smem:[#allocation10_spill]] %s3440_s22 }
  0x1a   : > { %p591_p9 = pnand %p2320_p7, %p590_p8 }
  0x1b   : > { %s3442_s24 = sld [smem:[#allocation12_spill]] (!%p591_p9)  ;;  %p650_p10 = scmp.lt.s32.totalorder (!%p591_p9), %s2912_s3, 1 }
  0x1c   : > { %594 = sbr.rel (%p591_p9) target bundleno = 3324 (0xcfc), region = 104  ;;  %s3443_s22 = sld [smem:[#allocation11_spill]] (!%p591_p9) }
  0x1d   : > { %s3446_s6 = sld [smem:[#allocation17_spill]] (!%p591_p9)  ;;  %s2393_s27 = sshll.u32 (!%p591_p9), %s2912_s3, 8 }
  0x1e   : > { %s3447_s7 = sld [smem:[#allocation18_spill]] (!%p591_p9) }
  0x1f   : > { %s3448_s2 = sld [smem:[#allocation14_spill]] (!%p591_p9) }
  0x20   : > { %s3450_s26 = sld [smem:[#allocation15_spill]] (!%p591_p9) }
  0x21   : > { %v2647_v0 = vld [vmem:[%s3442_s24 + $0xac] ss:$12 sps:$4 sm:$0xff]   ;;  %v2649_v1 = vld [vmem:[%s3442_s24 + $0xa8] ss:$12 sps:$4 sm:$0xff]   ;;  %v2775_v2 = vmov 0.0   ;;  %v2776_v3 = vmov 0   ;;  %v710_v29 = vlaneseq }
  0x22   : > { %2458 = vmatprep.subr.bf16.mxu1 %v2775_v2  ;;  %885 = vmatprep.mubr.bf16.mxu0 %v2776_v3  ;;  %v2650_v4 = vld [vmem:[%s3442_s24 + $0x94] ss:$12 sps:$4 sm:$0xff]   ;;  %v2652_v5 = vld [vmem:[%s3442_s24 + $0x90] ss:$12 sps:$4 sm:$0xff]   ;;  %vm2777_vm0 = vmmov 0   ;;  %s651_s4 = scalar_select %p650_p10, %s2912_s3, 1 }
  0x23   : > { %853 = vmatprep.subr.bf16.mxu0 %v2647_v0  ;;  %2474 = vmatprep.mubr.msk.bf16.mxu1 %vm2777_vm0, %v2775_v2  ;;  %v2653_v6 = vld [vmem:[%s3442_s24 + $0xb0] ss:$12 sps:$4 sm:$0xff]   ;;  %v2657_v8 = vld [vmem:[%s3442_s24 + $0x98] ss:$12 sps:$4 sm:$0xff]   ;;  %v2661_v11 = vld [vmem:[%s3442_s24 + $0x80] ss:$12 sps:$4 sm:$0xff]  }
  0x24   : > { %854 = vmatpush1.bf16.msra.mxu0 %v2649_v1  ;;  %2646 = vset.pattern.permute.xlu1 %v2776_v3  ;;  %v2654_v7 = vld [vmem:[%s3442_s24 + $0x7c] ss:$12 sps:$4 sm:$0xff]   ;;  %v2656_v9 = vld [vmem:[%s3442_s24 + $0x78] ss:$12 sps:$4 sm:$0xff]   ;;  %v2660_v12 = vld [vmem:[%s3442_s24 + $0x60] ss:$12 sps:$4 sm:$0xff]  }
  0x25   : > { %855 = vmatprep.subr.bf16.mxu0 %v2650_v4  ;;  %2645 = vset.pattern.permute.xlu0 %v2776_v3  ;;  %v2658_v10 = vld [vmem:[%s3442_s24 + $0x64] ss:$12 sps:$4 sm:$0xff]   ;;  %v2662_v13 = vld [vmem:[%s3442_s24 + $0x4c] ss:$12 sps:$4 sm:$0xff]   ;;  %v2665_v14 = vld [vmem:[%s3442_s24 + $0x68] ss:$12 sps:$4 sm:$0xff]  }
  0x26   : > { %2459 = vmatpush3.bf16.msra.mxu1 %v2653_v6  ;;  %v2664_v15 = vld [vmem:[%s3442_s24 + $0x48] ss:$12 sps:$4 sm:$0xff]   ;;  %v2669_v17 = vld [vmem:[%s3442_s24 + $0x50] ss:$12 sps:$4 sm:$0xff]   ;;  %s2392_s23 = sshll.u32 %s651_s4, 4  ;;  %v711_v30 = vshrl.u32 %v710_v29, 7 }
  0x27   : > { %2460 = vmatprep.subr.bf16.mxu1 %v2775_v2  ;;  %v2666_v16 = vld [vmem:[%s3442_s24 + $0x34] ss:$12 sps:$4 sm:$0xff]   ;;  %v2668_v18 = vld [vmem:[%s3442_s24 + $0x30] ss:$12 sps:$4 sm:$0xff]   ;;  %v2673_v20 = vld [vmem:[%s3442_s24 + $0x38] ss:$12 sps:$4 sm:$0xff]   ;;  %s654_s30 = scalar_lea.vmem %s3443_s22, %s2392_s23 }
  0x28   : > { %856 = vmatpush1.bf16.msra.mxu0 %v2652_v5  ;;  %v2670_v19 = vld [vmem:[%s3442_s24 + $0x1c] ss:$12 sps:$4 sm:$0xff]   ;;  %v2672_v21 = vld [vmem:[%s3442_s24 + $0x18] ss:$12 sps:$4 sm:$0xff]   ;;  %v2677_v23 = vld [vmem:[%s3442_s24 + $0x20] ss:$12 sps:$4 sm:$0xff]  }
  0x29   : > { %857 = vmatprep.subr.bf16.mxu0 %v2654_v7  ;;  %v2674_v22 = vld [vmem:[%s3442_s24 + $0x4] ss:$12 sps:$4 sm:$0xff]   ;;  %v2676_v24 = vld [vmem:[%s3442_s24] ss:$12 sps:$4 sm:$0xff]   ;;  %v2678_v27 = vld [vmem:[%s3442_s24 + $0x8] ss:$12 sps:$4 sm:$0xff]  }
  0x2a   : > { %2461 = vmatpush3.bf16.msra.mxu1 %v2657_v8  ;;  %v3024_v25 = vld [vmem:[%s654_s30] sm:$0xff]  ;;  %v3026_v26 = vld [vmem:[%s654_s30 + $0x8] sm:$0xff]  ;;  %v720_v31 = vsub.s32 2, %v711_v30  ;;  %v716_v32 = vsub.s32 1, %v711_v30  ;;  %s3444_s4 = sld [smem:[#allocation13_spill]]  ;;  %v712_v34 = vsub.s32 0, %v711_v30 }
  0x2b   : > { %2462 = vmatprep.subr.bf16.mxu1 %v2775_v2  ;;  %v675_v28 = vpack.c.bf16 %v3026_v26, %v3024_v25  ;;  %s3445_s22 = sld [smem:[#allocation16_spill]]  ;;  %vm966_vm1 = vcmask 130048   ;;  %v2681_v57 = vld [vmem:[%s3446_s6] sm:$0xff]   ;;  %v2682_v58 = vld [vmem:[%s3446_s6 + $0x8] sm:$0xff]   ;;  %vm1111_vm2 = vcmask 7168   ;;  %vm1179_vm3 = vcmask 261120  }
  0x2c   : > { %858 = vmatpush1.bf16.msra.mxu0 %v2656_v9  ;;  %vm1465_vm4 = vcmask 1043456   ;;  %vm1461_vm5 = vcmask 64512   ;;  %vm1912_vm6 = vcmask 1041408   ;;  %vm1908_vm7 = vcmask 31744   ;;  %s3451_s23 = sld [smem:[#allocation19_spill]] }
  0x2d   : > { %859 = vmatprep.subr.bf16.mxu0 %v2658_v10 }
  0x2e   : > { %2463 = vmatpush3.bf16.msra.mxu1 %v2661_v11 }
  0x2f   : > { %2464 = vmatprep.subr.bf16.mxu1 %v2775_v2 }
  0x30   : > { %860 = vmatpush1.bf16.msra.mxu0 %v2660_v12  ;;  %v708_v33 = vld [vmem:[%s3444_s4] sm:$0x7]  ;;  %s3449_s4 = smov %s3448_s2 }
  0x31   : > { %861 = vmatprep.subr.bf16.mxu0 %v2662_v13  ;;  %v721_v36 = vrot.slane %v708_v33, %v720_v31  ;;  %v717_v39 = vrot.slane %v708_v33, %v716_v32  ;;  %v713_v40 = vrot.slane %v708_v33, %v712_v34  ;;  %v2679_v55 = vld [vmem:[%s3445_s22] sm:$0xff]   ;;  %v2680_v56 = vld [vmem:[%s3445_s22 + $0x8] sm:$0xff]  }
  0x32   : > { %2465 = vmatpush3.bf16.msra.mxu1 %v2665_v14  ;;  %s3350_s28 = scalar_lea.hbm %s3451_s23, %s2393_s27 }
  0x33   : > { %2466 = vmatprep.subr.bf16.mxu1 %v2775_v2 }
  0x34   : > { %862 = vmatpush1.bf16.msra.mxu0 %v2664_v15 }
  0x35   : > { %863 = vmatprep.subr.bf16.mxu0 %v2666_v16 }
  0x36   : > { %2467 = vmatpush3.bf16.msra.mxu1 %v2669_v17  ;;  %v954_v17 = vld [vmem:[%s3400_s8 + $0x10] sm:$0xff] }
  0x37   : > { %2468 = vmatprep.subr.bf16.mxu1 %v2775_v2 }
  0x38   : > { %864 = vmatpush1.bf16.msra.mxu0 %v2668_v18  ;;  %v952_v18 = vld [vmem:[%s3400_s8] sm:$0xff] }
  0x39   : > { %865 = vmatprep.subr.bf16.mxu0 %v2670_v19  ;;  %v955_v19 = vld [vmem:[%s3400_s8 + $0x18] sm:$0xff] }
  0x3a   : > { %2469 = vmatpush3.bf16.msra.mxu1 %v2673_v20 }
  0x3b   : > { %2470 = vmatprep.subr.bf16.mxu1 %v2775_v2 }
  0x3c   : > { %866 = vmatpush1.bf16.msra.mxu0 %v2672_v21 }
  0x3d   : > { %867 = vmatprep.subr.bf16.mxu0 %v2674_v22  ;;  %v953_v22 = vld [vmem:[%s3400_s8 + $0x8] sm:$0xff] }
  0x3e   : > { %2471 = vmatpush3.bf16.msra.mxu1 %v2677_v23 }
  0x3f   : > { %2472 = vmatprep.subr.bf16.mxu1 %v2775_v2 }
  0x40   : > { %868 = vmatpush1.bf16.msra.mxu0 %v2676_v24 }
  0x41   : > { %2495 = vmatprep.subr.bf16.mxu0 %v2775_v2 }
  0x42   : > { %2473 = vmatpush3.bf16.msra.mxu1 %v2678_v27 }
  0x43   : > { %886 = vmatmul.mubr.bf16.vlgmr.msra.gmra.mxu0 %v675_v28 }
  0x44   : > { %2511 = vmatprep.mubr.msk.bf16.mxu0 %vm2777_vm0, %v2775_v2 }
  0x45   : > { %2475 = vmatmul.mubr.bf16.vlgmr.msra.gmra.mxu1 %v675_v28 }
  0x46   : > { %1005 = vmatprep.mubr.bf16.mxu1 %v2776_v3 }
 0x103   : > { %v887_v35 = vpop.f32.mrf.mxu0 }
 0x104   : > { %v3044_v50 = vadd.f32 %v887_v35, %v713_v40 }
 0x105   : > { %v889_v37 = vpop.f32.mrf.mxu0  ;;  %v930_v38 = vpop.f32.mrf.mxu1 }
 0x106   : > { %v931_v43 = vadd.f32 %v930_v38, %v721_v36  ;;  %v890_v47 = vadd.f32 %v889_v37, %v717_v39 }
 0x107   : > { %v891_v41 = vpop.f32.mrf.mxu0  ;;  %v2476_v42 = vpop.f32.mrf.mxu1 }
 0x108   : > { %v3042_v44 = vadd.f32 %v891_v41, %v713_v40 }
 0x109   : > { %v893_v45 = vpop.f32.mrf.mxu0  ;;  %v933_v46 = vpop.f32.mrf.mxu1 }
 0x10a   : > { %v894_v48 = vadd.f32 %v893_v45, %v717_v39  ;;  %v934_v49 = vadd.f32 %v933_v46, %v721_v36  ;;  %v3052_v54 = vpack.c.bf16 %v3042_v44, %v3044_v50 }
 0x10b   : > { %v2477_v51 = vpop.f32.mrf.mxu1 }
 0x10c   : > { %v3046_v52 = vpack.c.bf16 %v894_v48, %v890_v47  ;;  %v3048_v53 = vpack.c.bf16 %v934_v49, %v931_v43 }
 0x10e   : > { %987 = vmatprep.subr.bf16.mxu1 %v3046_v52 }
 0x10f   : > { %988 = vmatpush1.bf16.msra.mxu1 %v3052_v54 }
 0x110   : > { %2478 = vmatprep.subr.bf16.mxu1 %v3048_v53 }
 0x112   : > { %2350 = vmatmul.mubr.msk.bf16.vlgmr.msra.gmra.mxu1 %vm966_vm1, %v2679_v55 }
 0x113   : > { %2479 = vmatpush3.bf16.msra.mxu1 %v3048_v53  ;;  %1015 = vmatprep.mubr.bf16.mxu1 %v2776_v3 }
 0x11a   : > { %2351 = vmatmul.mubr.msk.bf16.gmra.mxu1 %vm966_vm1, %v2680_v56 }
 0x11b   : > { %2480 = vmatprep.mubr.msk.bf16.mxu1 %vm966_vm1, %v2681_v57 }
 0x122   : > { %2481 = vmatmul.mubr.msk.bf16.vlgmr.msra.gmra.mxu1 %vm966_vm1, %v2682_v58 }
 0x1d2   : > { %v3075_v59 = vpop.f32.mrf.mxu1 }
 0x1d4   : > { %v1009_v60 = vpop.f32.mrf.mxu1 }
 0x1d6   : > { %v3077_v61 = vpop.f32.mrf.mxu1 }
 0x1d8   : > { %v1013_v62 = vpop.f32.mrf.mxu1 }
 0x1da   : > { %v3079_v63 = vpop.f32.mrf.mxu1 }
 0x1dc   : > { %v1019_v0 = vpop.f32.mrf.mxu1 }
 0x1de   : > { %v3081_v1 = vpop.f32.mrf.mxu1 }
 0x1e0   : > { %v1023_v4 = vpop.f32.mrf.mxu1 }
 0x1e2   : > { %v2482_v5 = vpop.f32.mrf.mxu1 }
 0x1e3   : > { %v1093_v6 = vmul.f32 %v2482_v5, %v1019_v0 }
 0x1e4   : > { %v1076_v7 = vpop.f32.mrf.mxu1 }
 0x1e5   : > { %1099 = vadd.xlane.f32.xlu1 %v1093_v6  ;;  %v1091_v8 = vmul.f32 %v1076_v7, %v1009_v60 }
 0x1e6   : > { %v2483_v9 = vpop.f32.mrf.mxu1 }
 0x1e7   : > { %v1094_v10 = vmul.f32 %v2483_v9, %v1023_v4  ;;  %1095 = vadd.xlane.f32.xlu0 %v1091_v8 }
 0x1e8   : > { %v1079_v11 = vpop.f32.mrf.mxu1 }
 0x1e9   : > { %v1092_v12 = vmul.f32 %v1079_v11, %v1013_v62  ;;  %1101 = vadd.xlane.f32.xlu1 %v1094_v10 }
 0x1eb   : > { %1097 = vadd.xlane.f32.xlu0 %v1092_v12 }
 0x26e   : > { %v1100_v13 = vpop.xlane.xlu1 %1099 }
 0x26f   : > { %v1105_v15 = vmul.f32 0.17677669, %v1100_v13 }
 0x270   : > { %v1096_v14 = vpop.xlane.xlu0 %1095 }
 0x271   : > { %v1103_v16 = vmul.f32 0.17677669, %v1096_v14  ;;  %v1109_v24 = vmul.f32 %v1105_v15, %v954_v17 }
 0x272   : > { %v1102_v20 = vpop.xlane.xlu1 %1101 }
 0x273   : > { %v1106_v21 = vmul.f32 0.17677669, %v1102_v20  ;;  %v1107_v27 = vmul.f32 %v1103_v16, %v952_v18  ;;  %v1114_v32 = vsel %vm1111_vm2, %v1109_v24, -inf }
 0x274   : > { %v1098_v23 = vpop.xlane.xlu0 %1097 }
 0x275   : > { %v1110_v28 = vmul.f32 %v1106_v21, %v955_v19  ;;  %v1104_v29 = vmul.f32 0.17677669, %v1098_v23  ;;  %v1112_v33 = vsel %vm1111_vm2, %v1107_v27, -inf  ;;  %v950_v21 = vld [vmem:[%s3447_s7] sm:$0xff]  ;;  %v3116_v23 = vld [vmem:[%s3449_s4 + $0x30] sm:$0xff]  }
 0x276   : > { %2492 = vmatprep.mubr.msk.f32.mxu1 %vm1179_vm3, %v950_v21 }
 0x277   : > { %v1115_v30 = vsel %vm1111_vm2, %v1110_v28, -inf  ;;  %v1108_v31 = vmul.f32 %v1104_v29, %v953_v22  ;;  %v3110_v22 = vld [vmem:[%s3448_s2 + $0x38] sm:$0xff]   ;;  %v3144_v29 = vld [vmem:[%s3449_s4 + $0x10] sm:$0xff]   ;;  %s647_s2 = sand.u32 1, %s2765_s25  }
 0x278   : > { %v1117_v35 = vmax.f32 %v1114_v32, %v1115_v30  ;;  %2496 = vmatpush3.bf16.msra.mxu0 %v3110_v22  ;;  %v3151_v30 = vld [vmem:[%s3449_s4 + $0x8] sm:$0xff]   ;;  %s2321_s0 = sshll.u32 %s647_s2, 4  ;;  %s3352_s21 = scalar_lea.sflag [#allocation3], %s647_s2 }
 0x279   : > { %v1113_v34 = vsel %vm1111_vm2, %v1108_v31, -inf  ;;  %2497 = vmatprep.subr.bf16.mxu0 %v2775_v2  ;;  %s649_s1 = scalar_lea.vmem [#allocation2], %s2321_s0  ;;  %s2778_s0 = smov [#allocation2]  }
 0x27a   : > { %v1116_v36 = vmax.f32 %v1112_v33, %v1113_v34  ;;  %s2255_s30 = sshll.u32 %s649_s1, 4  ;;  %s3344_s30 = int_to_ptr.vmem [resolvable:$true] %s2255_s30 }
 0x27b   : > { %s2713_s3 = scalar_lea.vmem %s3344_s30, 256 }
 0x27c   : > { %v1118_v37 = vmax.f32 %v1116_v36, %v1117_v35  ;;  %2498 = vmatpush3.bf16.msra.mxu0 %v3116_v23  ;;  %p2714_p11 = scmp.ne.s32.totalorder %s3344_s30, %s2713_s3 }
 0x27d   : > { %2499 = vmatprep.subr.bf16.mxu0 %v2775_v2 }
 0x27e   : > { %v1119_v38 = vrot.slane %v1118_v37, 4  ;;  %p2715_p12 = pnand %p2714_p11, %p2929_p5 }
 0x280   : > { %v1120_v39 = vmax.f32 %v1118_v37, %v1119_v38  ;;  %p2716_p13 = pneg %p2715_p12 }
 0x282   : > { %v1121_v40 = vrot.slane %v1120_v39, 2 }
 0x284   : > { %v1122_v41 = vmax.f32 %v1120_v39, %v1121_v40  ;;  %v951_v39 = vld [vmem:[%s3447_s7 + $0x8] sm:$0xff] }
 0x286   : > { %v1123_v42 = vrot.slane %v1122_v41, 1 }
 0x288   : > { %v1124_v43 = vmax.f32 %v1122_v41, %v1123_v42 }
 0x28a   : > { %v1125_v45 = vsub.f32 %v1107_v27, %v1124_v43  ;;  %v1126_v46 = vsub.f32 %v1108_v31, %v1124_v43  ;;  %v1127_v47 = vsub.f32 %v1109_v24, %v1124_v43  ;;  %v1128_v48 = vsub.f32 %v1110_v28, %v1124_v43  ;;  %v3123_v24 = vld [vmem:[%s3449_s4 + $0x28] sm:$0xff]   ;;  %v3130_v27 = vld [vmem:[%s3449_s4 + $0x20] sm:$0xff]   ;;  %v3137_v28 = vld [vmem:[%s3449_s4 + $0x18] sm:$0xff]  }
 0x28b   : > { %2500 = vmatpush3.bf16.msra.mxu0 %v3123_v24 }
 0x28c   : > { %v1129_v49 = vmul.f32 1.442695, %v1125_v45  ;;  %v1131_v51 = vmul.f32 1.442695, %v1126_v46  ;;  %v1133_v55 = vmul.f32 1.442695, %v1127_v47  ;;  %2501 = vmatprep.subr.bf16.mxu0 %v2775_v2 }
 0x28d   : > { %v1135_v56 = vmul.f32 1.442695, %v1128_v48  ;;  %v2691_v45 = vld [vmem:[%s3402_s10] sm:$0xff]  }
 0x28e   : > { %2693 = vpow2.f32 %v1129_v49 }
 0x28f   : > { %2695 = vpow2.f32 %v1131_v51  ;;  %2502 = vmatpush3.bf16.msra.mxu0 %v3130_v27 }
 0x290   : > { %2697 = vpow2.f32 %v1133_v55  ;;  %2503 = vmatprep.subr.bf16.mxu0 %v2775_v2 }
 0x291   : > { %2699 = vpow2.f32 %v1135_v56  ;;  %v2692_v56 = vld [vmem:[%s3403_s11] sm:$0xff]  }
 0x293   : > { %2504 = vmatpush3.bf16.msra.mxu0 %v3137_v28 }
 0x294   : > { %2505 = vmatprep.subr.bf16.mxu0 %v2775_v2 }
 0x297   : > { %2506 = vmatpush3.bf16.msra.mxu0 %v3144_v29 }
 0x298   : > { %2507 = vmatprep.subr.bf16.mxu0 %v2775_v2 }
 0x29b   : > { %v2694_v57 = vpop.eup %2693  ;;  %2508 = vmatpush3.bf16.msra.mxu0 %v3151_v30 }
 0x29c   : > { %v2696_v58 = vpop.eup %2695  ;;  %v1137_v60 = vsel %vm1111_vm2, %v2694_v57, 0.0  ;;  %2509 = vmatprep.subr.bf16.mxu0 %v2775_v2 }
 0x29d   : > { %v2698_v62 = vpop.eup %2697  ;;  %v1138_v0 = vsel %vm1111_vm2, %v2696_v58, 0.0 }
 0x29e   : > { %v2700_v4 = vpop.eup %2699  ;;  %v1139_v5 = vadd.f32 %v1138_v0, %v1137_v60  ;;  %v1140_v6 = vsel %vm1111_vm2, %v2698_v62, 0.0 }
 0x29f   : > { %v1142_v8 = vsel %vm1111_vm2, %v2700_v4, 0.0 }
 0x2a0   : > { %v1141_v7 = vadd.f32 %v1140_v6, %v1139_v5 }
 0x2a2   : > { %v1143_v9 = vadd.f32 %v1142_v8, %v1141_v7 }
 0x2a4   : > { %v1144_v10 = vrot.slane %v1143_v9, 4 }
 0x2a6   : > { %v1145_v11 = vadd.f32 %v1144_v10, %v1143_v9  ;;  %v941_v10 = vadd.f32 %v3042_v44, %v3026_v26  ;;  %v1454_v26 = vld [vmem:[%s3405_s13] sm:$0xff]  ;;  %v1455_v44 = vld [vmem:[%s3405_s13 + $0x8] sm:$0xff] }
 0x2a8   : > { %v1146_v12 = vrot.slane %v1145_v11, 2 }
 0x2aa   : > { %v1147_v13 = vadd.f32 %v1146_v12, %v1145_v11 }
 0x2ac   : > { %v1148_v14 = vrot.slane %v1147_v13, 1 }
 0x2ae   : > { %v1149_v15 = vadd.f32 %v1148_v14, %v1147_v13 }
 0x2b0   : > { %2701 = vrcp.f32 %v1149_v15 }
 0x2bd   : > { %v2702_v16 = vpop.eup %2701 }
 0x2be   : > { %v1154_v17 = vmul.f32 %v2702_v16, %v2700_v4  ;;  %v1153_v18 = vmul.f32 %v2702_v16, %v2698_v62  ;;  %v1152_v19 = vmul.f32 %v2702_v16, %v2696_v58  ;;  %v1151_v20 = vmul.f32 %v2702_v16, %v2694_v57  ;;  %v3231_v58 = vld [vmem:[%s3450_s26] ss:$0 sm:$0xff] }
 0x2bf   : > { %v940_v4 = vadd.f32 %v3044_v50, %v3024_v25 }
 0x2c0   : > { %1172 = vperm.xlu0 %2645, %v1154_v17   ;;  %1167 = vperm.xlu1 %2646, %v1153_v18  }
 0x2c4   : > { %1162 = vperm.xlu1 %2646, %v1152_v19  }
 0x2c8   : > { %1157 = vperm.xlu1 %2646, %v1151_v20  }
 0x33b   : > { %v1173_v31 = vpop.permute.xlu0 %1172  ;;  %v1168_v32 = vpop.permute.xlu1 %1167 }
 0x33c   : > { %v1178_v33 = vmul.f32 %v1173_v31, %v3081_v1  ;;  %v1177_v34 = vmul.f32 %v1168_v32, %v3079_v63 }
 0x33e   : > { %2484 = vmatprep.subr.mxu1 %v1178_v33 }
 0x33f   : > { %2485 = vmatpush3.msra.mxu1 %v1178_v33  ;;  %v1163_v35 = vpop.permute.xlu1 %1162 }
 0x340   : > { %v1176_v36 = vmul.f32 %v1163_v35, %v3077_v61  ;;  %2486 = vmatprep.subr.mxu1 %v1177_v34  ;;  %v1361_v61 = vld [vmem:[%s3401_s9] sm:$0xf] }
 0x341   : > { %2487 = vmatpush3.msra.mxu1 %v1177_v34 }
 0x342   : > { %2488 = vmatprep.subr.mxu1 %v1176_v36 }
 0x343   : > { %2489 = vmatpush3.msra.mxu1 %v1176_v36  ;;  %v1158_v37 = vpop.permute.xlu1 %1157 }
 0x344   : > { %v1175_v38 = vmul.f32 %v1158_v37, %v3075_v59 }
 0x346   : > { %2490 = vmatprep.subr.mxu1 %v1175_v38 }
 0x347   : > { %2491 = vmatpush3.msra.mxu1 %v1175_v38 }
 0x348   : > { %2493 = vmatmul.mubr.msk.f32.vlgmr.msra.gmra.mxu1 %vm1179_vm3, %v951_v39  ;;  %1379 = vmatprep.subr.bf16.mxu1 %v3046_v52  ;;  %v3180_v52 = vld [vmem:[%s3449_s4] sm:$0xff]   ;;  %s2717_s4 = sshll.u32 %s2778_s0, 4  ;;  %s2718_s4 = int_to_ptr.vmem [resolvable:$false] %s2717_s4 }
 0x349   : > { %1380 = vmatpush1.bf16.msra.mxu1 %v3052_v54  ;;  %1397 = vmatprep.mubr.bf16.mxu1 %v2776_v3  ;;  %s2719_s6 = scalar_lea.vmem %s2718_s4, 512  ;;  %p2720_p0 = scmp.lt.s32.totalorder %s3344_s30, %s2718_s4 }
 0x34a   : > { %2515 = vmatprep.subr.bf16.mxu1 %v2775_v2  ;;  %2510 = vmatpush3.bf16.msra.mxu0 %v3180_v52  ;;  %p2721_p1 = scmp.lt.s32.totalorder %s2719_s6, %s2713_s3 }
 0x34b   : > { %2527 = vmatprep.subr.mxu0 %v2775_v2 }
 0x34c   : > { %2367 = vmatmul.mubr.msk.bf16.vlgmr.msra.gmra.mxu1 %vm966_vm1, %v1361_v61  ;;  %p2722_p2 = por %p2721_p1, %p2720_p0 }
 0x34d   : > { %2516 = vmatpush3.bf16.msra.mxu1 %v3048_v53  ;;  %2517 = vmatprep.mubr.msk.bf16.mxu1 %vm2777_vm0, %v2775_v2 }
 0x34e   : > { %p2723_p3 = pnand %p2722_p2, %p2716_p13 }
 0x354   : > { %2518 = vmatmul.mubr.msk.bf16.vlgmr.msra.gmra.mxu1 %vm966_vm1, %v1361_v61 }
 0x355   : > { %1504 = vmatprep.mubr.bf16.mxu1 %v2776_v3 }
 0x408   : > { %v2494_v54 = vpop.f32.mrf.mxu1 }
 0x40a   : > { %v1252_v59 = vpop.f32.mrf.mxu1 }
 0x40b   : > { %v1261_v63 = vpack.c.bf16 %v2494_v54, %v1252_v59 }
 0x40c   : > { %v1399_v53 = vpop.f32.mrf.mxu1 }
 0x40d   : > { %v1446_v1 = vpack.c.bf16 %v1399_v53, %v1399_v53  ;;  %2512 = vmatmul.mubr.bf16.vlgmr.msra.gmra.mxu0 %v1261_v63 }
 0x40e   : > { %v1401_v40 = vpop.f32.mrf.mxu1  ;;  %2531 = vmatprep.mubr.msk.f32.mxu0 %vm2777_vm0, %v2775_v2 }
 0x40f   : > { %v3186_v41 = vpack.c.bf16 %v1401_v40, %v1401_v40  ;;  %v3189_v43 = vsel %vm1465_vm4, %v1446_v1, 0 }
 0x410   : > { %v1403_v42 = vpop.f32.mrf.mxu1 }
 0x411   : > { %2370 = vmatprep.subr.msk.bf16.mxu1 %vm1465_vm4, %v3186_v41 }
 0x412   : > { %v1404_v46 = vpop.f32.mrf.mxu1  ;;  %1487 = vmatpush1.bf16.msra.mxu1 %v3189_v43 }
 0x413   : > { %2521 = vmatprep.subr.bf16.mxu1 %v2775_v2 }
 0x414   : > { %v1440_v47 = vpop.f32.mrf.mxu1 }
 0x415   : > { %v1448_v48 = vpack.c.bf16 %v1440_v47, %v1440_v47  ;;  %2371 = vmatmul.mubr.msk.bf16.vlgmr.msra.gmra.mxu1 %vm1461_vm5, %v2691_v45 }
 0x416   : > { %v2519_v49 = vpop.f32.mrf.mxu1  ;;  %2523 = vmatprep.mubr.msk.bf16.mxu1 %vm2777_vm0, %v2775_v2 }
 0x417   : > { %v3202_v51 = vsel %vm1465_vm4, %v1448_v48, 0 }
 0x418   : > { %v1443_v55 = vpop.f32.mrf.mxu1  ;;  %2522 = vmatpush3.bf16.msra.mxu1 %v3202_v51 }
 0x419   : > { %2534 = vmatprep.subr.bf16.mxu1 %v2775_v2 }
 0x41a   : > { %v2520_v57 = vpop.f32.mrf.mxu1 }
 0x41d   : > { %2524 = vmatmul.mubr.msk.bf16.vlgmr.msra.gmra.mxu1 %vm1461_vm5, %v2692_v56 }
 0x41e   : > { %2535 = vmatpush3.bf16.msra.mxu1 %v3110_v22  ;;  %2550 = vmatprep.mubr.msk.bf16.mxu1 %vm2777_vm0, %v2775_v2 }
 0x41f   : > { %2536 = vmatprep.subr.bf16.mxu1 %v2775_v2 }
 0x422   : > { %2537 = vmatpush3.bf16.msra.mxu1 %v3116_v23 }
 0x423   : > { %2538 = vmatprep.subr.bf16.mxu1 %v2775_v2 }
 0x426   : > { %2539 = vmatpush3.bf16.msra.mxu1 %v3123_v24 }
 0x427   : > { %2540 = vmatprep.subr.bf16.mxu1 %v2775_v2 }
 0x42a   : > { %2541 = vmatpush3.bf16.msra.mxu1 %v3130_v27 }
 0x42b   : > { %2542 = vmatprep.subr.bf16.mxu1 %v2775_v2 }
 0x42e   : > { %2543 = vmatpush3.bf16.msra.mxu1 %v3137_v28 }
 0x42f   : > { %2544 = vmatprep.subr.bf16.mxu1 %v2775_v2 }
 0x432   : > { %2545 = vmatpush3.bf16.msra.mxu1 %v3144_v29 }
 0x433   : > { %2546 = vmatprep.subr.bf16.mxu1 %v2775_v2 }
 0x436   : > { %2547 = vmatpush3.bf16.msra.mxu1 %v3151_v30 }
 0x437   : > { %2548 = vmatprep.subr.bf16.mxu1 %v2775_v2 }
 0x43a   : > { %2549 = vmatpush3.bf16.msra.mxu1 %v3180_v52 }
 0x43b   : > { %2571 = vmatprep.subr.mxu1 %v2775_v2 }
 0x4cd   : > { %v1350_v60 = vpop.f32.mrf.mxu0 }
 0x4ce   : > { %v1351_v62 = vadd.f32 %v3231_v58, %v1350_v60 }
 0x4cf   : > { %v2513_v0 = vpop.f32.mrf.mxu0 }
 0x4d0   : > { %v1357_v5 = vmax.f32 %v1351_v62, 0.0 }
 0x4d1   : > { %v1353_v6 = vpop.f32.mrf.mxu0 }
 0x4d2   : > { %v1354_v7 = vadd.f32 %v3231_v58, %v1353_v6  ;;  %v3237_v8 = vadd.f32 %v1357_v5, %v940_v4 }
 0x4d3   : > { %v2514_v9 = vpop.f32.mrf.mxu0 }
 0x4d4   : > { %v1358_v11 = vmax.f32 %v1354_v7, 0.0 }
 0x4d5   : > { %v1506_v12 = vpop.f32.mrf.mxu1 }
 0x4d6   : > { %v3241_v13 = vadd.f32 %v1358_v11, %v941_v10 }
 0x4d7   : > { %v1508_v14 = vpop.f32.mrf.mxu1 }
 0x4d9   : > { %v1510_v15 = vpop.f32.mrf.mxu1 }
 0x4db   : > { %v1512_v16 = vpop.f32.mrf.mxu1 }
 0x4dd   : > { %v1560_v17 = vpop.f32.mrf.mxu1 }
 0x4de   : > { %v1567_v18 = vmul.f32 %v1560_v17, %v1508_v14 }
 0x4df   : > { %v2525_v25 = vpop.f32.mrf.mxu1 }
 0x4e0   : > { %1569 = vadd.xlane.f32.xlu1 %v1567_v18 }
 0x4e1   : > { %v1563_v50 = vpop.f32.mrf.mxu1 }
 0x4e2   : > { %v1568_v19 = vmul.f32 %v1563_v50, %v1512_v16  ;;  %v1453_v16 = vld [vmem:[%s3404_s12] sm:$0xff] }
 0x4e3   : > { %v2526_v20 = vpop.f32.mrf.mxu1 }
 0x4e4   : > { %1571 = vadd.xlane.f32.xlu0 %v1568_v19 }
 0x569   : > { %v1570_v21 = vpop.xlane.xlu1 %1569 }
 0x56a   : > { %v1573_v31 = vmul.f32 0.17677669, %v1570_v21 }
 0x56c   : > { %v1575_v33 = vmul.f32 %v1573_v31, %v1454_v26  ;;  %v1732_v31 = vld [vmem:[%s3406_s14 + $0x8] sm:$0xff] }
 0x56d   : > { %v1572_v32 = vpop.xlane.xlu0 %1571 }
 0x56e   : > { %v1574_v34 = vmul.f32 0.17677669, %v1572_v32  ;;  %v1577_v36 = vsel %vm1111_vm2, %v1575_v33, -inf }
 0x570   : > { %v1576_v35 = vmul.f32 %v1574_v34, %v1455_v44  ;;  %v1816_v44 = vld [vmem:[%s3407_s15] sm:$0x3] }
 0x572   : > { %v1578_v37 = vsel %vm1111_vm2, %v1576_v35, -inf }
 0x573   : > { %v1579_v38 = vmax.f32 %v1577_v36, %v1578_v37 }
 0x575   : > { %v1580_v39 = vrot.slane %v1579_v38, 4 }
 0x577   : > { %v1581_v61 = vmax.f32 %v1579_v38, %v1580_v39 }
 0x579   : > { %v1582_v54 = vrot.slane %v1581_v61, 2 }
 0x57b   : > { %v1583_v59 = vmax.f32 %v1581_v61, %v1582_v54 }
 0x57d   : > { %v1584_v63 = vrot.slane %v1583_v59, 1 }
 0x57f   : > { %v1585_v53 = vmax.f32 %v1583_v59, %v1584_v63 }
 0x581   : > { %v1586_v1 = vsub.f32 %v1575_v33, %v1585_v53  ;;  %v1587_v40 = vsub.f32 %v1576_v35, %v1585_v53  ;;  %v1905_v53 = vld [vmem:[%s3409_s17] sm:$0xf] }
 0x583   : > { %v1588_v42 = vmul.f32 1.442695, %v1586_v1  ;;  %v1590_v45 = vmul.f32 1.442695, %v1587_v40 }
 0x585   : > { %2703 = vpow2.f32 %v1588_v42 }
 0x586   : > { %2705 = vpow2.f32 %v1590_v45 }
 0x592   : > { %v2704_v46 = vpop.eup %2703 }
 0x593   : > { %v2706_v47 = vpop.eup %2705  ;;  %v1592_v48 = vsel %vm1111_vm2, %v2704_v46, 0.0 }
 0x594   : > { %v1593_v49 = vsel %vm1111_vm2, %v2706_v47, 0.0 }
 0x595   : > { %v1594_v55 = vadd.f32 %v1593_v49, %v1592_v48 }
 0x597   : > { %v1595_v56 = vrot.slane %v1594_v55, 4 }
 0x599   : > { %v1596_v57 = vadd.f32 %v1595_v56, %v1594_v55 }
 0x59b   : > { %v1597_v60 = vrot.slane %v1596_v57, 2 }
 0x59d   : > { %v1598_v62 = vadd.f32 %v1597_v60, %v1596_v57 }
 0x59f   : > { %v1599_v0 = vrot.slane %v1598_v62, 1 }
 0x5a1   : > { %v1600_v4 = vadd.f32 %v1599_v0, %v1598_v62 }
 0x5a3   : > { %2707 = vrcp.f32 %v1600_v4 }
 0x5b0   : > { %v2708_v5 = vpop.eup %2707 }
 0x5b1   : > { %v1603_v6 = vmul.f32 %v2708_v5, %v2706_v47  ;;  %v1602_v7 = vmul.f32 %v2708_v5, %v2704_v46 }
 0x5b3   : > { %1611 = vperm.xlu1 %2646, %v1603_v6   ;;  %1606 = vperm.xlu0 %2645, %v1602_v7  }
 0x62e   : > { %v1612_v9 = vpop.permute.xlu1 %1611  ;;  %v1607_v10 = vpop.permute.xlu0 %1606 }
 0x62f   : > { %v1615_v11 = vmul.f32 %v1612_v9, %v1510_v15  ;;  %v1614_v14 = vmul.f32 %v1607_v10, %v1506_v12  ;;  %v1731_v12 = vld [vmem:[%s3406_s14] sm:$0xff] }
 0x631   : > { %2528 = vmatpush3.msra.mxu0 %v1615_v11 }
 0x632   : > { %2529 = vmatprep.subr.mxu0 %v2775_v2 }
 0x633   : > { %2530 = vmatpush3.msra.mxu0 %v1614_v14 }
 0x634   : > { %2532 = vmatmul.mubr.msk.f32.vlgmr.msra.gmra.mxu0 %vm966_vm1, %v1453_v16 }
 0x635   : > { %2556 = vmatprep.mubr.msk.f32.mxu0 %vm1461_vm5, %v1731_v12 }
 0x6f4   : > { %v1685_v17 = vpop.f32.mrf.mxu0 }
 0x6f5   : > { %v1689_v18 = vpack.c.bf16 %v1685_v17, %v1685_v17 }
 0x6f6   : > { %v2533_v25 = vpop.f32.mrf.mxu0 }
 0x6f7   : > { %2551 = vmatmul.mubr.bf16.vlgmr.msra.gmra.mxu1 %v1689_v18  ;;  %v1906_v25 = vld [vmem:[%s3410_s18] sm:$0xf] }
 0x6f8   : > { %2573 = vmatprep.mubr.msk.f32.mxu1 %vm2777_vm0, %v2775_v2 }
 0x7b7   : > { %v1724_v15 = vpop.f32.mrf.mxu1 }
 0x7b8   : > { %v1725_v50 = vadd.f32 %v3231_v58, %v1724_v15 }
 0x7b9   : > { %v2552_v19 = vpop.f32.mrf.mxu1 }
 0x7ba   : > { %v1730_v20 = vmax.f32 %v1725_v50, 0.0  ;;  %v2151_v19 = vld [vmem:[%s3412_s20] sm:$0xff] }
 0x7bb   : > { %v1727_v21 = vpop.f32.mrf.mxu1 }
 0x7bc   : > { %2554 = vmatprep.subr.mxu0 %v1730_v20 }
 0x7bd   : > { %v2553_v26 = vpop.f32.mrf.mxu1  ;;  %2555 = vmatpush3.msra.mxu0 %v1730_v20 }
 0x7be   : > { %2557 = vmatmul.mubr.msk.f32.vlgmr.msra.gmra.mxu0 %vm1461_vm5, %v1732_v31  ;;  %2377 = vmatprep.subr.msk.bf16.mxu0 %vm1465_vm4, %v3186_v41 }
 0x7bf   : > { %1835 = vmatpush1.bf16.msra.mxu0 %v3189_v43  ;;  %1852 = vmatprep.mubr.bf16.mxu0 %v2776_v3 }
 0x7c0   : > { %2559 = vmatprep.subr.bf16.mxu0 %v2775_v2 }
 0x7c2   : > { %2378 = vmatmul.mubr.msk.bf16.vlgmr.msra.gmra.mxu0 %vm1461_vm5, %v1816_v44 }
 0x7c3   : > { %2560 = vmatpush3.bf16.msra.mxu0 %v3202_v51  ;;  %2561 = vmatprep.mubr.msk.bf16.mxu0 %vm2777_vm0, %v2775_v2 }
 0x7ca   : > { %2562 = vmatmul.mubr.msk.bf16.vlgmr.msra.gmra.mxu0 %vm1461_vm5, %v1816_v44 }
 0x7cb   : > { %1951 = vmatprep.mubr.bf16.mxu0 %v2776_v3  ;;  %v1904_v3 = vld [vmem:[%s3408_s16] sm:$0xf] }
 0x87e   : > { %v2558_v41 = vpop.f32.mrf.mxu0 }
 0x87f   : > { %v3284_v43 = vadd.f32 %v2558_v41, %v3241_v13  ;;  %v2152_v41 = vld [vmem:[%s3412_s20 + $0x8] sm:$0xff] }
 0x880   : > { %v1805_v32 = vpop.f32.mrf.mxu0 }
 0x881   : > { %v3287_v33 = vadd.f32 %v1805_v32, %v3237_v8 }
 0x882   : > { %v1854_v34 = vpop.f32.mrf.mxu0 }
 0x883   : > { %v1901_v35 = vpack.c.bf16 %v1854_v34, %v1854_v34 }
 0x884   : > { %v1856_v36 = vpop.f32.mrf.mxu0 }
 0x885   : > { %v1902_v51 = vpack.c.bf16 %v1856_v36, %v1856_v36  ;;  %v1914_v38 = vsel %vm1912_vm6, %v1901_v35, 0 }
 0x886   : > { %v1858_v37 = vpop.f32.mrf.mxu0 }
 0x887   : > { %2380 = vmatprep.subr.msk.bf16.mxu0 %vm1912_vm6, %v1902_v51 }
 0x888   : > { %v1859_v39 = vpop.f32.mrf.mxu0  ;;  %1934 = vmatpush1.bf16.msra.mxu0 %v1914_v38 }
 0x889   : > { %2565 = vmatprep.subr.bf16.mxu0 %v2775_v2 }
 0x88a   : > { %v1895_v8 = vpop.f32.mrf.mxu0 }
 0x88b   : > { %v1903_v13 = vpack.c.bf16 %v1895_v8, %v1895_v8  ;;  %2381 = vmatmul.mubr.msk.bf16.vlgmr.msra.gmra.mxu0 %vm1908_vm7, %v1904_v3 }
 0x88c   : > { %v2563_v61 = vpop.f32.mrf.mxu0  ;;  %2567 = vmatprep.mubr.msk.bf16.mxu0 %vm2777_vm0, %v2775_v2 }
 0x88d   : > { %v1964_v54 = vsel %vm1912_vm6, %v1903_v13, 0 }
 0x88e   : > { %v1898_v59 = vpop.f32.mrf.mxu0  ;;  %2566 = vmatpush3.bf16.msra.mxu0 %v1964_v54 }
 0x88f   : > { %2576 = vmatprep.subr.bf16.mxu0 %v2775_v2 }
 0x890   : > { %v2564_v63 = vpop.f32.mrf.mxu0 }
 0x893   : > { %2568 = vmatmul.mubr.msk.bf16.vlgmr.msra.gmra.mxu0 %vm1908_vm7, %v1905_v53 }
 0x894   : > { %2577 = vmatpush3.bf16.msra.mxu0 %v3110_v22  ;;  %2592 = vmatprep.mubr.msk.bf16.mxu0 %vm2777_vm0, %v2775_v2 }
 0x895   : > { %2578 = vmatprep.subr.bf16.mxu0 %v2775_v2 }
 0x898   : > { %2579 = vmatpush3.bf16.msra.mxu0 %v3116_v23 }
 0x899   : > { %2580 = vmatprep.subr.bf16.mxu0 %v2775_v2 }
 0x89c   : > { %2581 = vmatpush3.bf16.msra.mxu0 %v3123_v24 }
 0x89d   : > { %2582 = vmatprep.subr.bf16.mxu0 %v2775_v2 }
 0x8a0   : > { %2583 = vmatpush3.bf16.msra.mxu0 %v3130_v27 }
 0x8a1   : > { %2584 = vmatprep.subr.bf16.mxu0 %v2775_v2 }
 0x8a4   : > { %2585 = vmatpush3.bf16.msra.mxu0 %v3137_v28 }
 0x8a5   : > { %2586 = vmatprep.subr.bf16.mxu0 %v2775_v2 }
 0x8a8   : > { %2587 = vmatpush3.bf16.msra.mxu0 %v3144_v29  ;;  %v1907_v29 = vld [vmem:[%s3411_s19] sm:$0xff] }
 0x8a9   : > { %2588 = vmatprep.subr.bf16.mxu0 %v2775_v2 }
 0x8ac   : > { %2589 = vmatpush3.bf16.msra.mxu0 %v3151_v30 }
 0x8ad   : > { %2590 = vmatprep.subr.bf16.mxu0 %v2775_v2 }
 0x8b0   : > { %2591 = vmatpush3.bf16.msra.mxu0 %v3180_v52 }
 0x94b   : > { %v1953_v22 = vpop.f32.mrf.mxu0 }
 0x94d   : > { %v1955_v23 = vpop.f32.mrf.mxu0 }
 0x94f   : > { %v1957_v24 = vpop.f32.mrf.mxu0 }
 0x951   : > { %v1958_v27 = vpop.f32.mrf.mxu0 }
 0x953   : > { %v2000_v1 = vpop.f32.mrf.mxu0 }
 0x954   : > { %v2006_v40 = vmul.f32 %v2000_v1, %v1955_v23 }
 0x955   : > { %v2569_v42 = vpop.f32.mrf.mxu0 }
 0x956   : > { %2007 = vadd.xlane.f32.xlu1 %v2006_v40 }
 0x957   : > { %v2003_v28 = vpop.f32.mrf.mxu0 }
 0x959   : > { %v2570_v45 = vpop.f32.mrf.mxu0 }
 0x9df   : > { %v2008_v46 = vpop.xlane.xlu1 %2007 }
 0x9e0   : > { %v2009_v30 = vmul.f32 0.17677669, %v2008_v46 }
 0x9e2   : > { %v2010_v47 = vmul.f32 %v2009_v30, %v1907_v29 }
 0x9e4   : > { %v2011_v2 = vsel %vm1111_vm2, %v2010_v47, -inf }
 0x9e5   : > { %v2012_v52 = vrot.slane %v2011_v2, 4 }
 0x9e7   : > { %v2013_v48 = vmax.f32 %v2011_v2, %v2012_v52 }
 0x9e9   : > { %v2014_v49 = vrot.slane %v2013_v48, 2 }
 0x9eb   : > { %v2015_v55 = vmax.f32 %v2013_v48, %v2014_v49 }
 0x9ed   : > { %v2016_v56 = vrot.slane %v2015_v55, 1 }
 0x9ef   : > { %v2017_v57 = vmax.f32 %v2015_v55, %v2016_v56 }
 0x9f1   : > { %v2018_v60 = vsub.f32 %v2010_v47, %v2017_v57 }
 0x9f3   : > { %v2019_v62 = vmul.f32 1.442695, %v2018_v60 }
 0x9f5   : > { %2709 = vpow2.f32 %v2019_v62 }
 0xa02   : > { %v2710_v0 = vpop.eup %2709 }
 0xa03   : > { %v2021_v4 = vsel %vm1111_vm2, %v2710_v0, 0.0 }
 0xa04   : > { %v2022_v5 = vrot.slane %v2021_v4, 4 }
 0xa06   : > { %v2023_v6 = vadd.f32 %v2022_v5, %v2021_v4 }
 0xa08   : > { %v2024_v7 = vrot.slane %v2023_v6, 2 }
 0xa0a   : > { %v2025_v9 = vadd.f32 %v2024_v7, %v2023_v6 }
 0xa0c   : > { %v2026_v10 = vrot.slane %v2025_v9, 1 }
 0xa0e   : > { %v2027_v11 = vadd.f32 %v2026_v10, %v2025_v9 }
 0xa10   : > { %2711 = vrcp.f32 %v2027_v11 }
 0xa1d   : > { %v2712_v14 = vpop.eup %2711 }
 0xa1e   : > { %v2029_v16 = vmul.f32 %v2712_v14, %v2710_v0 }
 0xa20   : > { %2032 = vperm.xlu0 %2645, %v2029_v16  }
 0xa9b   : > { %v2033_v17 = vpop.permute.xlu0 %2032 }
 0xa9c   : > { %v2035_v18 = vmul.f32 %v2033_v17, %v1953_v22 }
 0xa9e   : > { %2572 = vmatpush3.msra.mxu1 %v2035_v18 }
 0xa9f   : > { %2574 = vmatmul.mubr.msk.f32.vlgmr.msra.gmra.mxu1 %vm1461_vm5, %v1906_v25 }
 0xaa0   : > { %2598 = vmatprep.mubr.msk.f32.mxu1 %vm1908_vm7, %v2151_v19 }
 0xb5f   : > { %v2105_v12 = vpop.f32.mrf.mxu1 }
 0xb60   : > { %v2109_v15 = vpack.c.bf16 %v2105_v12, %v2105_v12 }
 0xb61   : > { %v2575_v50 = vpop.f32.mrf.mxu1 }
 0xb62   : > { %2593 = vmatmul.mubr.bf16.vlgmr.msra.gmra.mxu0 %v2109_v15 }
 0xc22   : > { %v2144_v20 = vpop.f32.mrf.mxu0 }
 0xc23   : > { %v2145_v21 = vadd.f32 %v3231_v58, %v2144_v20 }
 0xc24   : > { %v2594_v31 = vpop.f32.mrf.mxu0 }
 0xc25   : > { %v2150_v26 = vmax.f32 %v2145_v21, 0.0 }
 0xc26   : > { %v2147_v44 = vpop.f32.mrf.mxu0 }
 0xc27   : > { %2596 = vmatprep.subr.msk.mxu1 %vm1465_vm4, %v2150_v26 }
 0xc28   : > { %v2595_v32 = vpop.f32.mrf.mxu0  ;;  %2597 = vmatpush3.msk.msra.mxu1 %vm1465_vm4, %v2150_v26 }
 0xc29   : > { %2599 = vmatmul.mubr.msk.f32.vlgmr.msra.gmra.mxu1 %vm1908_vm7, %v2152_v41 }
 0xce9   : > { %v2600_v58 = vpop.f32.mrf.mxu1 }
 0xcea   : > { %v2238_v34 = vadd.f32 %v2600_v58, %v3284_v43 }
 0xceb   : > { %v2228_v35 = vpop.f32.mrf.mxu1 }
 0xcec   : > { %2240 = vst [vmem:[%s649_s1 + $0x8] sm:$0xff] %v2238_v34  ;;  %v2237_v36 = vadd.f32 %v2228_v35, %v3287_v33 }
 0xcee   : > { %2239 = vst [vmem:[%s649_s1] sm:$0xff] %v2237_v36 }
 0xcef   : > { %2726 = shalt.err (!%p2723_p3)
}
 0xcf0   : > { %s2727_s2 = scalar_lea.hbm %s3350_s28, 256  ;;  %s2731_s26 = scalar_lea.hbm %s3451_s23, 512 }
 0xcf1   : > { %p2728_p4 = scmp.ne.s32.totalorder %s3350_s28, %s2727_s2  ;;  %p2732_p9 = scmp.lt.s32.totalorder %s3350_s28, %s3451_s23 }
 0xcf2   : > { %p2733_p10 = scmp.lt.s32.totalorder %s2731_s26, %s2727_s2 }
 0xcf3   : > { %p2729_p7 = pnand %p2728_p4, %p2929_p5 }
 0xcf4   : > { %p2734_p11 = por %p2733_p10, %p2732_p9 }
 0xcf5   : > { %p2730_p8 = pneg %p2729_p7 }
 0xcf7   : > { %p2735_p12 = pnand %p2734_p11, %p2730_p8 }
 0xcf9   : > { %2738 = shalt.err (!%p2735_p12)
}
 0xcfa   : > { %s2779_s6 = smov 128   ;;  %s2780_s4 = smov 8  }
 0xcfb   : > { %2601 = dma.vmem_to_hbm [thread:$0]  (%p2929_p5), %s3344_s30, 256, %s3350_s28, %s3352_s21, %s2779_s6, %s2779_s6, %s2780_s4  }
 0xcfc PF: > { %s3452_s3 = sld [smem:[#allocation7_spill]] }
 0xcfd   : > { %s3453_s1 = sld [smem:[#allocation5_spill]] }
 0xd02   : > { %p2607_p13 = scmp.ge.s32.totalorder %s3452_s3, 2 }
 0xd03   : > { %s2270_s7 = sand.u32 1, %s3453_s1  }
 0xd04   : > { %p2604_p0 = pnand %p2607_p13, %p2933_p6  ;;  %s2271_s2 = scalar_lea.sflag [#allocation3], %s2270_s7 }
 0xd06   : > { %p2605_p1 = pneg %p2604_p0 }
 0xd08   : > { %2756 = dma.done.wait (%p2605_p1), %s2271_s2, 256  }
 0xd09   : > { %2758 = vsyncadd (%p2605_p1), %s2271_s2, 4294967040  ;;  %s3455_s27 = sld [smem:[#allocation8_spill]]  ;;  %s3458_s2 = smov %s2765_s25 }
 0xd0a   : > { %s3456_s26 = sld [smem:[#allocation6_spill]] }
 0xd0b   : > { %s3457_s29 = sld [smem:[#allocation9_spill]] }
 0xd0f   : > { %p31_p2 = scmp.ge.s32.totalorder %s3455_s27, 4  }
 0xd10   : > { %s3459_s25 = smov %s3456_s26 }
 0xd11   : > { %s3460_s26 = smov %s3457_s29  ;;  %33 = sbr.rel (!%p31_p2) target bundleno = 13 (0xd), region = 139 }
 0xd16   :  { %2276 = vsyncpa [#allocation3], 1 }
 0xd17   :  { %2278 = vsyncpa [#allocation3 + $0x1], 1 }

</bundles_post_ra>
